<compile_context>
chip_gen: v7x
topology: tpu7x:2x2x1
jax: 0.10.0
libtpu: 0.0.40
codegen_flags: <defaults>
</compile_context>

<pallas_src>
import functools

import jax
import jax.numpy as jnp
from jax.experimental import pallas as pl
from jax.experimental.pallas import tpu as pltpu

_LANE = 128


def _linear_reg_kernel(x_ref, w_ref, b_ref, out_ref, acc_ref, *, k_total, tk):
    """One K-tile of  y = flatten(x) @ w.T + b  (out_features == 1).

    x_ref   : (B, tk)   current K tile of the flattened features   (VMEM)
    w_ref   : (1, tk)   matching K tile of the single weight row    (VMEM)
    b_ref   : (1,)      bias                                        (SMEM)
    out_ref : (B, 1)    regression output, written on the last step
    acc_ref : (B, tk)   f32 VMEM accumulator of per-lane partial products
    """
    k = pl.program_id(0)
    last = pl.num_programs(0) - 1

    @pl.when(k == 0)
    def _():
        acc_ref[...] = jnp.zeros_like(acc_ref)

    x = x_ref[...].astype(jnp.float32)
    w = w_ref[...].astype(jnp.float32)
    prod = x * w

    if k_total % tk == 0:
        # Exact tiling (default vgg16 path): no masking anywhere in the loop.
        acc_ref[...] += prod
    else:
        # Ragged K: only the final tile extends past k_total, so only that one
        # step pays for the iota / compare / select.
        @pl.when(k != last)
        def _():
            acc_ref[...] += prod

        @pl.when(k == last)
        def _():
            col = jax.lax.broadcasted_iota(jnp.int32, prod.shape, 1) + k * tk
            acc_ref[...] += jnp.where(col < k_total, prod, 0.0)

    @pl.when(k == last)
    def _():
        # One cross-lane reduce + bias add + cast at the very end.
        total = jnp.sum(acc_ref[...], axis=1, keepdims=True)        # (B, 1)
        out_ref[...] = (total + b_ref[0]).astype(out_ref.dtype)


def _pick_tk(k_total, batch, *, vmem_block_budget=4 << 20):
    """Largest lane-aligned K tile within the VMEM budget, preferring a tile
    that exactly divides K so the in-kernel tail mask can be dropped."""
    k_pad = pl.cdiv(k_total, _LANE) * _LANE
    # f32 bytes per tk-column resident in VMEM: x block (double-buffered by the
    # pipeline) + accumulator + w block (double-buffered).
    bytes_per_col = 4 * (3 * max(batch, 1) + 2)
    cap = max(_LANE, (vmem_block_budget // bytes_per_col) // _LANE * _LANE)
    tk = min(k_pad, cap)
    if k_total % _LANE == 0 and k_total % tk != 0:
        best = None
        d = _LANE
        while d <= tk:
            if k_total % d == 0:
                best = d
            d += _LANE
        if best is not None:
            tk = best
    return tk


def quality_predictor_forward(x, weight, bias, *, tk=None):
    """QualityPredictor(encoder_arch='vgg16', mid_f=False).forward(x).

    x      : (B, C, H, W) encoder feature map (any float dtype)
    weight : (1, C*H*W)   nn.Linear weight
    bias   : (1,)         nn.Linear bias
    returns: (B, 1)
    """
    batch = x.shape[0]
    x2 = x.reshape(batch, -1)            # free reshape, no extra HBM traffic
    k_total = x2.shape[1]
    w2 = weight.reshape(1, k_total)

    if tk is None:
        tk = _pick_tk(k_total, batch)
    else:
        tk = max(_LANE, (tk // _LANE) * _LANE)
        tk = min(tk, pl.cdiv(k_total, _LANE) * _LANE)
    grid = (pl.cdiv(k_total, tk),)

    out_dtype = jnp.promote_types(x.dtype, weight.dtype)
    kernel = functools.partial(_linear_reg_kernel, k_total=k_total, tk=tk)

    return pl.pallas_call(
        kernel,
        out_shape=jax.ShapeDtypeStruct((batch, 1), out_dtype),
        grid=grid,
        in_specs=[
            pl.BlockSpec((batch, tk), lambda k: (0, k)),
            pl.BlockSpec((1, tk), lambda k: (0, k)),
            pl.BlockSpec(memory_space=pltpu.MemorySpace.SMEM),
        ],
        out_specs=pl.BlockSpec((batch, 1), lambda k: (0, 0)),
        scratch_shapes=[pltpu.VMEM((batch, tk), jnp.float32)],
        compiler_params=pltpu.CompilerParams(
            dimension_semantics=("arbitrary",),   # K is a reduction axis
        ),
    )(x2, w2, bias.astype(jnp.float32))


if __name__ == "__main__":
    key = jax.random.PRNGKey(0)
    k_x, k_w, k_x2, k_w2 = jax.random.split(key, 4)

    # vgg16 / mid_f=False: input is the VGG16 feature map (B, 512, 7, 7).
    B, C, H, W = 2, 512, 7, 7
    x = jax.random.normal(k_x, (B, C, H, W), dtype=jnp.float32)

    in_dims = C * H * W
    # model_init(): kaiming_normal_(fan_in, relu) weights, zero bias.
    std = (2.0 / in_dims) ** 0.5
    weight = std * jax.random.normal(k_w, (1, in_dims), dtype=jnp.float32)
    bias = jnp.zeros((1,), dtype=jnp.float32)

    y = quality_predictor_forward(x, weight, bias)
    jax.block_until_ready(y)

    # Pure-JAX reference (same math, no matmul-precision ambiguity).
    ref = jnp.sum(x.reshape(B, -1) * weight, axis=-1, keepdims=True) + bias
    assert y.shape == (B, 1), y.shape
    assert jnp.allclose(y, ref, rtol=1e-4, atol=1e-4), (y, ref)

    # Secondary check: ragged / non-lane-aligned K exercises the masked tail
    # branch and the multi-step reduction grid.
    B2, C2, H2, W2 = 2, 4, 16, 15                         # K = 960 (not %128)
    x_r = jax.random.normal(k_x2, (B2, C2, H2, W2), dtype=jnp.float32)
    in_r = C2 * H2 * W2
    w_r = (2.0 / in_r) ** 0.5 * jax.random.normal(k_w2, (1, in_r), jnp.float32)
    b_r = jnp.zeros((1,), dtype=jnp.float32)
    y_r = quality_predictor_forward(x_r, w_r, b_r, tk=512)
    jax.block_until_ready(y_r)
    ref_r = jnp.sum(x_r.reshape(B2, -1) * w_r, axis=-1, keepdims=True) + b_r
    assert jnp.allclose(y_r, ref_r, rtol=1e-4, atol=1e-4), (y_r, ref_r)

    print("KERNEL_OK")
</pallas_src>

<mosaic_0001>
module attributes {stable_mosaic.version = 11 : i64} {
  func.func @_linear_reg_kernel(%arg0: i32, %arg1: memref<2x25088xf32, #tpu.memory_space<vmem>>, %arg2: memref<1x25088xf32, #tpu.memory_space<vmem>>, %arg3: memref<1xf32, #tpu.memory_space<smem>>, %arg4: memref<2x1xf32, #tpu.memory_space<vmem>>, %arg5: memref<2x25088xf32, #tpu.memory_space<vmem>>) attributes {dimension_semantics = [#tpu.dimension_semantics<arbitrary>], iteration_bounds = array<i64: 1>, scalar_prefetch = 0 : i64, scratch_operands = 1 : i64, tpu.core_type = #tpu.core_type<tc>, window_params = [{transform_indices = @transform_0, window_bounds = array<i64: 2, 25088>}, {transform_indices = @transform_1, window_bounds = array<i64: 1, 25088>}, {transform_indices = @transform_2, window_bounds = array<i64: 1>}, {pipeline_mode = #tpu.pipeline_mode<synchronous>, transform_indices = @transform_3, window_bounds = array<i64: 2, 1>}]} {
    %c0_i32 = arith.constant 0 : i32
    %0 = arith.cmpi eq, %arg0, %c0_i32 : i32
    %1 = arith.extui %0 : i1 to i32
    %c0_i32_0 = arith.constant 0 : i32
    %2 = arith.cmpi ne, %1, %c0_i32_0 : i32
    scf.if %2 {
      %cst = arith.constant 0.000000e+00 : f32
      %13 = vector.broadcast %cst : f32 to vector<2x25088xf32>
      %c0_10 = arith.constant 0 : index
      %c0_11 = arith.constant 0 : index
      %14 = vector.load %arg5[%c0_10, %c0_11] : memref<2x25088xf32, #tpu.memory_space<vmem>>, vector<2x25088xf32>
      tpu.vector_store %arg5[%c0_10, %c0_11], %13 {strides = array<i32>} : memref<2x25088xf32, #tpu.memory_space<vmem>>, vector<2x25088xf32>,
    } else {
    }
    %c0 = arith.constant 0 : index
    %c0_1 = arith.constant 0 : index
    %3 = vector.load %arg1[%c0, %c0_1] : memref<2x25088xf32, #tpu.memory_space<vmem>>, vector<2x25088xf32>
    %c0_2 = arith.constant 0 : index
    %c0_3 = arith.constant 0 : index
    %4 = vector.load %arg2[%c0_2, %c0_3] : memref<1x25088xf32, #tpu.memory_space<vmem>>, vector<1x25088xf32>
    %5 = vector.broadcast %4 : vector<1x25088xf32> to vector<2x25088xf32>
    %6 = arith.mulf %3, %5 : vector<2x25088xf32>
    %c0_4 = arith.constant 0 : index
    %c0_5 = arith.constant 0 : index
    %7 = vector.load %arg5[%c0_4, %c0_5] : memref<2x25088xf32, #tpu.memory_space<vmem>>, vector<2x25088xf32>
    %8 = arith.addf %7, %6 : vector<2x25088xf32>
    %c0_6 = arith.constant 0 : index
    %c0_7 = arith.constant 0 : index
    %9 = vector.load %arg5[%c0_6, %c0_7] : memref<2x25088xf32, #tpu.memory_space<vmem>>, vector<2x25088xf32>
    tpu.vector_store %arg5[%c0_6, %c0_7], %8 {strides = array<i32>} : memref<2x25088xf32, #tpu.memory_space<vmem>>, vector<2x25088xf32>,
    %c0_i32_8 = arith.constant 0 : i32
    %10 = arith.cmpi eq, %arg0, %c0_i32_8 : i32
    %11 = arith.extui %10 : i1 to i32
    %c0_i32_9 = arith.constant 0 : i32
    %12 = arith.cmpi ne, %11, %c0_i32_9 : i32
    scf.if %12 {
      %c0_10 = arith.constant 0 : index
      %c0_11 = arith.constant 0 : index
      %13 = vector.load %arg5[%c0_10, %c0_11] : memref<2x25088xf32, #tpu.memory_space<vmem>>, vector<2x25088xf32>
      %cst = arith.constant dense<0.000000e+00> : vector<2xf32>
      %14 = vector.multi_reduction <add>, %13, %cst [1] : vector<2x25088xf32> to vector<2xf32>
      %15 = vector.shape_cast %14 : vector<2xf32> to vector<2x1xf32>
      %c0_12 = arith.constant 0 : index
      %16 = memref.load %arg3[%c0_12] : memref<1xf32, #tpu.memory_space<smem>>
      %17 = vector.broadcast %16 : f32 to vector<2x1xf32>
      %18 = arith.addf %15, %17 : vector<2x1xf32>
      %c0_13 = arith.constant 0 : index
      %c0_14 = arith.constant 0 : index
      %19 = vector.load %arg4[%c0_13, %c0_14] : memref<2x1xf32, #tpu.memory_space<vmem>>, vector<2x1xf32>
      tpu.vector_store %arg4[%c0_13, %c0_14], %18 {strides = array<i32>} : memref<2x1xf32, #tpu.memory_space<vmem>>, vector<2x1xf32>,
    } else {
    }
    return
  }
  func.func @transform_0(%arg0: i32) -> (i32, i32) {
    %c0_i32 = arith.constant 0 : i32
    %c0_i32_0 = arith.constant 0 : i32
    return %c0_i32, %arg0 : i32, i32
  }
  func.func @transform_1(%arg0: i32) -> (i32, i32) {
    %c0_i32 = arith.constant 0 : i32
    %c0_i32_0 = arith.constant 0 : i32
    return %c0_i32, %arg0 : i32, i32
  }
  func.func @transform_2(%arg0: i32) -> i32 {
    %c0_i32 = arith.constant 0 : i32
    %c0_i32_0 = arith.constant 0 : i32
    return %c0_i32 : i32
  }
  func.func @transform_3(%arg0: i32) -> (i32, i32) {
    %c0_i32 = arith.constant 0 : i32
    %c0_i32_0 = arith.constant 0 : i32
    %c0_i32_1 = arith.constant 0 : i32
    return %c0_i32, %c0_i32_0 : i32, i32
  }
}

</mosaic_0001>

<bundles_post_ra>
// kernel: tpu_custom_call.1
= control target key start
LH: loop header
LB: loop body
LE: loop exit
PB: predicated region body
PF: predicated region fallthrough
CT: control target
= control target key end

     0   :  { %9 = vsyncpa [#allocation5], 0  ;;  %s5119_s0 = inlined_call_operand.hbm [shape: f32[2,25088], index: 0, kind: input, shape index: {}]   ;;  %s5120_s1 = inlined_call_operand.hbm [shape: f32[1,25088], index: 1, kind: input, shape index: {}]   ;;  %s5121_s2 = inlined_call_operand.<no memory space> [shape: f32[1], index: 2, kind: input, shape index: {}]   ;;  %s5122_s3 = inlined_call_operand.vmem [shape: f32[2,1], index: 3, kind: output, shape index: {}]  }
   0x1   :  { %10 = vsyncpa [#allocation7], 0  ;;  %s3639_s12 = smov [#allocation4]   ;;  %s3640_s14 = smov [#allocation6]  }
   0x2   :  { %s17_s13 = sshll.u32 %s3639_s12, 4  ;;  %s27_s15 = sshll.u32 %s3640_s14, 4  ;;  %s18_s13 = int_to_ptr.vmem [resolvable:$true] %s17_s13  ;;  %s28_s15 = int_to_ptr.vmem [resolvable:$true] %s27_s15 }
   0x3   :  { %s3591_s18 = scalar_lea.hbm %s5119_s0, 6272 }
   0x4   :  { %p3592_p0 = scmp.ne.s32.totalorder %s5119_s0, %s3591_s18  ;;  %p3595_p1 = scmp.lt.u32.totalorder %s3591_s18, %s5119_s0 }
   0x6   :  { %p3597_p2 = pnand %p3595_p1, %p3592_p0 }
   0x8   :  { %3600 = shalt.err (!%p3597_p2)
}
   0x9   :  { %s3601_s23 = scalar_lea.vmem %s18_s13, 6272  ;;  %p3606_p4 = scmp.lt.s32.totalorder %s18_s13, %s18_s13 }
   0xa   :  { %p3602_p3 = scmp.ne.s32.totalorder %s18_s13, %s3601_s23  ;;  %p3607_p5 = scmp.lt.s32.totalorder %s3601_s23, %s3601_s23 }
   0xc   :  { %p3608_p6 = por %p3607_p5, %p3606_p4 }
   0xe   :  { %p3609_p7 = pnand %p3608_p6, %p3602_p3 }
  0x10   :  { %3612 = shalt.err (!%p3609_p7)
}
  0x11   :  { %20 = dma.hbm_to_vmem [thread:$0]  %s5119_s0, 6272, %s18_s13, [#allocation5]  }
  0x12   :  { %s3613_s28 = scalar_lea.hbm %s5120_s1, 3136 }
  0x13   :  { %p3614_p8 = scmp.ne.s32.totalorder %s5120_s1, %s3613_s28  ;;  %p3617_p9 = scmp.lt.u32.totalorder %s3613_s28, %s5120_s1 }
  0x15   :  { %p3619_p10 = pnand %p3617_p9, %p3614_p8 }
  0x17   :  { %3622 = shalt.err (!%p3619_p10)
}
  0x18   :  { %s3623_s6 = scalar_lea.vmem %s28_s15, 3136  ;;  %p3628_p12 = scmp.lt.s32.totalorder %s28_s15, %s28_s15 }
  0x19   :  { %p3624_p11 = scmp.ne.s32.totalorder %s28_s15, %s3623_s6  ;;  %p3629_p13 = scmp.lt.s32.totalorder %s3623_s6, %s3623_s6 }
  0x1b   :  { %p3630_p0 = por %p3629_p13, %p3628_p12 }
  0x1d   :  { %p3631_p1 = pnand %p3630_p0, %p3624_p11 }
  0x1f   :  { %3634 = shalt.err (!%p3631_p1)
}
  0x20   :  { %30 = dma.hbm_to_vmem [thread:$0]  %s5120_s1, 3136, %s28_s15, [#allocation7]  }
  0x21   :  { %3635 = dma.done.wait [#allocation5], 6272  }
  0x22   :  { %3636 = vsyncadd [#allocation5], 4294961024 }
  0x23   :  { %3637 = dma.done.wait [#allocation7], 3136  }
  0x24   :  { %3638 = vsyncadd [#allocation7], 4294964160  ;;  %v191_v0 = vlaneseq  ;;  %v3641_v1 = vmov 1983009808   ;;  %v3686_v5 = vld [vmem:[#allocation6 + $0x20] sm:$0xff]  ;;  %v3698_v11 = vld [vmem:[#allocation6 + $0x28] sm:$0xff] }
  0x25   :  { %v978_v2 = vunpack.c.l.s4 %v3641_v1  ;;  %v3716_v20 = vld [vmem:[#allocation6 + $0x30] sm:$0xff]  ;;  %v3734_v29 = vld [vmem:[#allocation6 + $0x38] sm:$0xff]  ;;  %v3752_v38 = vld [vmem:[#allocation6 + $0x40] sm:$0xff]  ;;  %vm3183_vm0 = vcmask 1041408   ;;  %vm3580_vm1 = vcmask 1024  }
  0x26   :  { %v192_v3 = vshrl.u32 %v191_v0, 7  ;;  %v3770_v47 = vld [vmem:[#allocation6 + $0x48] sm:$0xff]  ;;  %v3788_v56 = vld [vmem:[#allocation6 + $0x50] sm:$0xff]  ;;  %v3806_v1 = vld [vmem:[#allocation6 + $0x58] sm:$0xff] }
  0x27   :  { %v979_v4 = vunpack.c.0.s8 %v978_v2  ;;  %v3824_v59 = vld [vmem:[#allocation6 + $0x60] sm:$0xff]  ;;  %v3842_v60 = vld [vmem:[#allocation6 + $0x68] sm:$0xff]  ;;  %v3860_v57 = vld [vmem:[#allocation6 + $0x70] sm:$0xff] }
  0x28   :  { %v3688_v6 = vsub.s32 0, %v192_v3  ;;  %v3690_v7 = vsub.s32 1, %v192_v3  ;;  %v3692_v8 = vsub.s32 2, %v192_v3  ;;  %v3694_v9 = vsub.s32 3, %v192_v3  ;;  %v3878_v58 = vld [vmem:[#allocation6 + $0x78] sm:$0xff]  ;;  %v3896_v54 = vld [vmem:[#allocation6 + $0x80] sm:$0xff] }
  0x29   :  { %v3696_v10 = vsub.s32 4, %v192_v3  ;;  %v3700_v12 = vsub.s32 5, %v192_v3  ;;  %v3702_v13 = vsub.s32 6, %v192_v3  ;;  %v3704_v14 = vsub.s32 7, %v192_v3  ;;  %v3914_v55 = vld [vmem:[#allocation6 + $0x88] sm:$0xff]  ;;  %v3932_v52 = vld [vmem:[#allocation6 + $0x90] sm:$0xff] }
  0x2a   :  { %v3706_v15 = vsub.s32 %v979_v4, %v192_v3  ;;  %v322_v16 = vrot.slane %v3686_v5, %v3688_v6  ;;  %v326_v17 = vrot.slane %v3686_v5, %v3690_v7  ;;  %v330_v18 = vrot.slane %v3686_v5, %v3692_v8  ;;  %v3950_v53 = vld [vmem:[#allocation6 + $0x98] sm:$0xff]  ;;  %v3968_v50 = vld [vmem:[#allocation6 + $0xa0] sm:$0xff]  ;;  %v3986_v51 = vld [vmem:[#allocation6 + $0xa8] sm:$0xff] }
  0x2b   :  { %v334_v19 = vrot.slane %v3686_v5, %v3694_v9  ;;  %v338_v21 = vrot.slane %v3686_v5, %v3696_v10  ;;  %v342_v22 = vrot.slane %v3686_v5, %v3700_v12  ;;  %v346_v23 = vrot.slane %v3686_v5, %v3702_v13  ;;  %v4004_v48 = vld [vmem:[#allocation6 + $0xb0] sm:$0xff]  ;;  %v4022_v49 = vld [vmem:[#allocation6 + $0xb8] sm:$0xff]  ;;  %v4040_v45 = vld [vmem:[#allocation6 + $0xc0] sm:$0xf] }
  0x2c   :  { %v350_v24 = vrot.slane %v3686_v5, %v3704_v14  ;;  %v354_v25 = vrot.slane %v3698_v11, %v3688_v6  ;;  %v358_v26 = vrot.slane %v3698_v11, %v3690_v7  ;;  %v362_v27 = vrot.slane %v3698_v11, %v3692_v8 }
  0x2d   :  { %v366_v28 = vrot.slane %v3698_v11, %v3694_v9  ;;  %v370_v30 = vrot.slane %v3698_v11, %v3696_v10  ;;  %v374_v31 = vrot.slane %v3698_v11, %v3700_v12  ;;  %v378_v32 = vrot.slane %v3698_v11, %v3702_v13 }
  0x2e   :  { %v382_v33 = vrot.slane %v3698_v11, %v3704_v14  ;;  %v386_v34 = vrot.slane %v3716_v20, %v3688_v6  ;;  %v390_v35 = vrot.slane %v3716_v20, %v3690_v7  ;;  %v394_v36 = vrot.slane %v3716_v20, %v3692_v8 }
  0x2f   :  { %v398_v37 = vrot.slane %v3716_v20, %v3694_v9  ;;  %v402_v39 = vrot.slane %v3716_v20, %v3696_v10  ;;  %v406_v40 = vrot.slane %v3716_v20, %v3700_v12  ;;  %v410_v41 = vrot.slane %v3716_v20, %v3702_v13 }
  0x30   :  { %v414_v42 = vrot.slane %v3716_v20, %v3704_v14  ;;  %v418_v43 = vrot.slane %v3734_v29, %v3688_v6  ;;  %v422_v44 = vrot.slane %v3734_v29, %v3690_v7  ;;  %v430_v46 = vrot.slane %v3734_v29, %v3694_v9 }
  0x31   :  { %v934_v61 = vrot.slane %v4022_v49, %v3690_v7  ;;  %v1111_v4 = vcombine.low %v322_v16, %v326_v17  ;;  %v1112_v3 = vcombine.low %v330_v18, %v334_v19  ;;  %v1128_v17 = vcombine.low %v338_v21, %v342_v22 }
  0x32   :  { %v1129_v0 = vcombine.low %v346_v23, %v350_v24  ;;  %v1146_v5 = vcombine.low %v362_v27, %v366_v28  ;;  %v1162_v23 = vcombine.low %v370_v30, %v374_v31  ;;  %v1163_v24 = vcombine.low %v378_v32, %v382_v33 }
  0x33   :  { %v1119_v16 = vrot.slane %v1111_v4, %v3706_v15  ;;  %v1126_v19 = vrot.slane %v1112_v3, %v3706_v15  ;;  %v1145_v4 = vcombine.low %v354_v25, %v358_v26  ;;  %v1136_v21 = vrot.slane %v1128_v17, %v3706_v15 }
  0x34   :  { %v1143_v22 = vrot.slane %v1129_v0, %v3706_v15  ;;  %v1160_v27 = vrot.slane %v1146_v5, %v3706_v15  ;;  %v1179_v28 = vcombine.low %v386_v34, %v390_v35  ;;  %v1170_v31 = vrot.slane %v1162_v23, %v3706_v15 }
  0x35   :  { %v4126_v25 = vcombine.low %v1119_v16, %v1126_v19  ;;  %v1153_v26 = vrot.slane %v1145_v4, %v3706_v15  ;;  %v1177_v11 = vrot.slane %v1163_v24, %v3706_v15  ;;  %v1180_v32 = vcombine.low %v394_v36, %v398_v37 }
  0x36   :  { %v4136_v30 = vcombine.low %v1136_v21, %v1143_v22  ;;  %v1187_v0 = vrot.slane %v1179_v28, %v3706_v15  ;;  %v1196_v34 = vcombine.low %v402_v39, %v406_v40  ;;  %v1197_v35 = vcombine.low %v410_v41, %v414_v42 }
  0x37   :  { %v4146_v33 = vcombine.low %v1153_v26, %v1160_v27  ;;  %v4161_v3 = vcombine.low %v1170_v31, %v1177_v11  ;;  %v1194_v36 = vrot.slane %v1180_v32, %v3706_v15  ;;  %v1213_v37 = vcombine.low %v418_v43, %v422_v44 }
  0x38   :  { %v5123_v39 = vrot.slane %v3734_v29, %v3692_v8  ;;  %v1204_v20 = vrot.slane %v1196_v34, %v3706_v15  ;;  %v1211_v41 = vrot.slane %v1197_v35, %v3706_v15  ;;  %v5124_v42 = vrot.slane %v3734_v29, %v3700_v12 }
  0x39   :  { %v5125_v16 = vrot.slane %v3734_v29, %v3696_v10  ;;  %v5126_v43 = vrot.slane %v3734_v29, %v3704_v14  ;;  %v5127_v44 = vrot.slane %v3734_v29, %v3702_v13  ;;  %v4190_v4 = vcombine.low %v1187_v0, %v1194_v36 }
  0x3a   :  { %v1214_v40 = vcombine.low %v5123_v39, %v430_v46  ;;  %v1221_v46 = vrot.slane %v1213_v37, %v3706_v15  ;;  %v5128_v21 = vrot.slane %v3752_v38, %v3690_v7  ;;  %v5129_v22 = vrot.slane %v3752_v38, %v3688_v6 }
  0x3b   :  { %v1230_v17 = vcombine.low %v5125_v16, %v5124_v42  ;;  %v1231_v19 = vcombine.low %v5127_v44, %v5126_v43  ;;  %v4200_v24 = vcombine.low %v1204_v20, %v1211_v41  ;;  %v5130_v27 = vrot.slane %v3752_v38, %v3694_v9 }
  0x3c   :  { %v1228_v5 = vrot.slane %v1214_v40, %v3706_v15  ;;  %v1247_v23 = vcombine.low %v5129_v22, %v5128_v21  ;;  %v5131_v28 = vrot.slane %v3752_v38, %v3692_v8  ;;  %v5132_v0 = vrot.slane %v3752_v38, %v3700_v12 }
  0x3d   :  { %v1238_v26 = vrot.slane %v1230_v17, %v3706_v15  ;;  %v1245_v29 = vrot.slane %v1231_v19, %v3706_v15  ;;  %v5133_v34 = vrot.slane %v3752_v38, %v3696_v10  ;;  %v5134_v36 = vrot.slane %v3752_v38, %v3704_v14 }
  0x3e   :  { %v1248_v31 = vcombine.low %v5131_v28, %v5130_v27  ;;  %v4210_v11 = vcombine.low %v1221_v46, %v1228_v5  ;;  %v1255_v32 = vrot.slane %v1247_v23, %v3706_v15  ;;  %v5135_v37 = vrot.slane %v3752_v38, %v3702_v13 }
  0x3f   :  { %v1264_v35 = vcombine.low %v5133_v34, %v5132_v0  ;;  %v4225_v40 = vcombine.low %v1238_v26, %v1245_v29  ;;  %v5136_v41 = vrot.slane %v3770_v47, %v3690_v7  ;;  %v5137_v42 = vrot.slane %v3770_v47, %v3688_v6 }
  0x40   :  { %v1265_v39 = vcombine.low %v5135_v37, %v5134_v36  ;;  %v1262_v20 = vrot.slane %v1248_v31, %v3706_v15  ;;  %v5138_v17 = vrot.slane %v3770_v47, %v3694_v9  ;;  %v5139_v43 = vrot.slane %v3770_v47, %v3692_v8 }
  0x41   :  { %v1281_v16 = vcombine.low %v5137_v42, %v5136_v41  ;;  %v1272_v38 = vrot.slane %v1264_v35, %v3706_v15  ;;  %v5140_v46 = vrot.slane %v3770_v47, %v3700_v12  ;;  %v5141_v5 = vrot.slane %v3770_v47, %v3696_v10 }
  0x42   :  { %v1282_v44 = vcombine.low %v5139_v43, %v5138_v17  ;;  %v1279_v19 = vrot.slane %v1265_v39, %v3706_v15  ;;  %v5142_v22 = vrot.slane %v3770_v47, %v3704_v14  ;;  %v5143_v23 = vrot.slane %v3770_v47, %v3702_v13 }
  0x43   :  { %v1298_v21 = vcombine.low %v5141_v5, %v5140_v46  ;;  %v4254_v29 = vcombine.low %v1255_v32, %v1262_v20  ;;  %v1289_v27 = vrot.slane %v1281_v16, %v3706_v15  ;;  %v5144_v31 = vrot.slane %v3788_v56, %v3690_v7 }
  0x44   :  { %v1299_v26 = vcombine.low %v5143_v23, %v5142_v22  ;;  %v1296_v28 = vrot.slane %v1282_v44, %v3706_v15  ;;  %v5145_v0 = vrot.slane %v3788_v56, %v3688_v6  ;;  %v4264_v35 = vcombine.low %v1272_v38, %v1279_v19 }
  0x45   :  { %v1306_v36 = vrot.slane %v1298_v21, %v3706_v15  ;;  %v5146_v32 = vrot.slane %v3788_v56, %v3694_v9  ;;  %v5147_v37 = vrot.slane %v3788_v56, %v3692_v8  ;;  %v5148_v42 = vrot.slane %v3788_v56, %v3700_v12 }
  0x46   :  { %v1315_v34 = vcombine.low %v5145_v0, %v5144_v31  ;;  %v1313_v47 = vrot.slane %v1299_v26, %v3706_v15  ;;  %v4274_v20 = vcombine.low %v1289_v27, %v1296_v28  ;;  %v5149_v16 = vrot.slane %v3788_v56, %v3696_v10 }
  0x47   :  { %v1316_v39 = vcombine.low %v5147_v37, %v5146_v32  ;;  %v5150_v43 = vrot.slane %v3788_v56, %v3704_v14  ;;  %v5151_v44 = vrot.slane %v3788_v56, %v3702_v13  ;;  %v5152_v5 = vrot.slane %v3806_v1, %v3690_v7 }
  0x48   :  { %v1323_v41 = vrot.slane %v1315_v34, %v3706_v15  ;;  %v1332_v17 = vcombine.low %v5149_v16, %v5148_v42  ;;  %v4289_v19 = vcombine.low %v1306_v36, %v1313_v47  ;;  %v5153_v21 = vrot.slane %v3806_v1, %v3688_v6 }
  0x49   :  { %v1333_v38 = vcombine.low %v5151_v44, %v5150_v43  ;;  %v1330_v46 = vrot.slane %v1316_v39, %v3706_v15  ;;  %v5154_v23 = vrot.slane %v3806_v1, %v3694_v9  ;;  %v5155_v26 = vrot.slane %v3806_v1, %v3692_v8 }
  0x4a   :  { %v1349_v22 = vcombine.low %v5153_v21, %v5152_v5  ;;  %v1340_v56 = vrot.slane %v1332_v17, %v3706_v15  ;;  %v5156_v31 = vrot.slane %v3806_v1, %v3700_v12  ;;  %v5157_v0 = vrot.slane %v3806_v1, %v3696_v10 }
  0x4b   :  { %v1350_v27 = vcombine.low %v5155_v26, %v5154_v23  ;;  %v1347_v28 = vrot.slane %v1333_v38, %v3706_v15  ;;  %v5158_v36 = vrot.slane %v3806_v1, %v3704_v14  ;;  %v5159_v47 = vrot.slane %v3806_v1, %v3702_v13 }
  0x4c   :  { %v1366_v34 = vcombine.low %v5157_v0, %v5156_v31  ;;  %v4318_v37 = vcombine.low %v1323_v41, %v1330_v46  ;;  %v1357_v39 = vrot.slane %v1349_v22, %v3706_v15  ;;  %v5160_v16 = vrot.slane %v3824_v59, %v3690_v7 }
  0x4d   :  { %v1367_v32 = vcombine.low %v5159_v47, %v5158_v36  ;;  %v1364_v42 = vrot.slane %v1350_v27, %v3706_v15  ;;  %v5161_v17 = vrot.slane %v3824_v59, %v3688_v6  ;;  %v4328_v44 = vcombine.low %v1340_v56, %v1347_v28 }
  0x4e   :  { %v1374_v38 = vrot.slane %v1366_v34, %v3706_v15  ;;  %v5162_v41 = vrot.slane %v3824_v59, %v3694_v9  ;;  %v5163_v46 = vrot.slane %v3824_v59, %v3692_v8  ;;  %v5164_v23 = vrot.slane %v3824_v59, %v3700_v12 }
  0x4f   :  { %v1383_v43 = vcombine.low %v5161_v17, %v5160_v16  ;;  %v1381_v1 = vrot.slane %v1367_v32, %v3706_v15  ;;  %v4338_v21 = vcombine.low %v1357_v39, %v1364_v42  ;;  %v5165_v26 = vrot.slane %v3824_v59, %v3696_v10 }
  0x50   :  { %v1384_v5 = vcombine.low %v5163_v46, %v5162_v41  ;;  %v5166_v56 = vrot.slane %v3824_v59, %v3704_v14  ;;  %v5167_v28 = vrot.slane %v3824_v59, %v3702_v13  ;;  %v5168_v36 = vrot.slane %v3842_v60, %v3690_v7 }
  0x51   :  { %v1391_v22 = vrot.slane %v1383_v43, %v3706_v15  ;;  %v1400_v27 = vcombine.low %v5165_v26, %v5164_v23  ;;  %v4353_v0 = vcombine.low %v1374_v38, %v1381_v1  ;;  %v5169_v47 = vrot.slane %v3842_v60, %v3688_v6 }
  0x52   :  { %v1401_v31 = vcombine.low %v5167_v28, %v5166_v56  ;;  %v1398_v34 = vrot.slane %v1384_v5, %v3706_v15  ;;  %v5170_v39 = vrot.slane %v3842_v60, %v3694_v9  ;;  %v5171_v42 = vrot.slane %v3842_v60, %v3692_v8 }
  0x53   :  { %v1417_v32 = vcombine.low %v5169_v47, %v5168_v36  ;;  %v1408_v59 = vrot.slane %v1400_v27, %v3706_v15  ;;  %v5172_v43 = vrot.slane %v3842_v60, %v3700_v12  ;;  %v5173_v38 = vrot.slane %v3842_v60, %v3696_v10 }
  0x54   :  { %v1418_v16 = vcombine.low %v5171_v42, %v5170_v39  ;;  %v1415_v17 = vrot.slane %v1401_v31, %v3706_v15  ;;  %v5174_v41 = vrot.slane %v3842_v60, %v3704_v14  ;;  %v5175_v46 = vrot.slane %v3842_v60, %v3702_v13 }
  0x55   :  { %v1434_v1 = vcombine.low %v5173_v38, %v5172_v43  ;;  %v4382_v23 = vcombine.low %v1391_v22, %v1398_v34  ;;  %v1425_v26 = vrot.slane %v1417_v32, %v3706_v15  ;;  %v5176_v56 = vrot.slane %v3860_v57, %v3690_v7 }
  0x56   :  { %v1435_v5 = vcombine.low %v5175_v46, %v5174_v41  ;;  %v1432_v27 = vrot.slane %v1418_v16, %v3706_v15  ;;  %v5177_v28 = vrot.slane %v3860_v57, %v3688_v6  ;;  %v4392_v36 = vcombine.low %v1408_v59, %v1415_v17 }
  0x57   :  { %v1442_v47 = vrot.slane %v1434_v1, %v3706_v15  ;;  %v5178_v22 = vrot.slane %v3860_v57, %v3694_v9  ;;  %v5179_v34 = vrot.slane %v3860_v57, %v3692_v8  ;;  %v5180_v16 = vrot.slane %v3860_v57, %v3700_v12 }
  0x58   :  { %v1451_v31 = vcombine.low %v5177_v28, %v5176_v56  ;;  %v1449_v60 = vrot.slane %v1435_v5, %v3706_v15  ;;  %v4402_v39 = vcombine.low %v1425_v26, %v1432_v27  ;;  %v5181_v59 = vrot.slane %v3860_v57, %v3696_v10 }
  0x59   :  { %v1452_v32 = vcombine.low %v5179_v34, %v5178_v22  ;;  %v5182_v43 = vrot.slane %v3860_v57, %v3704_v14  ;;  %v5183_v38 = vrot.slane %v3860_v57, %v3702_v13  ;;  %v5184_v5 = vrot.slane %v3878_v58, %v3690_v7 }
  0x5a   :  { %v1459_v42 = vrot.slane %v1451_v31, %v3706_v15  ;;  %v1468_v17 = vcombine.low %v5181_v59, %v5180_v16  ;;  %v4417_v41 = vcombine.low %v1442_v47, %v1449_v60  ;;  %v5185_v26 = vrot.slane %v3878_v58, %v3688_v6 }
  0x5b   :  { %v1469_v1 = vcombine.low %v5183_v38, %v5182_v43  ;;  %v1466_v46 = vrot.slane %v1452_v32, %v3706_v15  ;;  %v5186_v56 = vrot.slane %v3878_v58, %v3694_v9  ;;  %v5187_v28 = vrot.slane %v3878_v58, %v3692_v8 }
  0x5c   :  { %v1485_v27 = vcombine.low %v5185_v26, %v5184_v5  ;;  %v1476_v57 = vrot.slane %v1468_v17, %v3706_v15  ;;  %v5188_v60 = vrot.slane %v3878_v58, %v3700_v12  ;;  %v5189_v22 = vrot.slane %v3878_v58, %v3696_v10 }
  0x5d   :  { %v1486_v31 = vcombine.low %v5187_v28, %v5186_v56  ;;  %v1483_v47 = vrot.slane %v1469_v1, %v3706_v15  ;;  %v5190_v32 = vrot.slane %v3878_v58, %v3704_v14  ;;  %v5191_v16 = vrot.slane %v3878_v58, %v3702_v13 }
  0x5e   :  { %v1502_v34 = vcombine.low %v5189_v22, %v5188_v60  ;;  %v4446_v43 = vcombine.low %v1459_v42, %v1466_v46  ;;  %v1493_v17 = vrot.slane %v1485_v27, %v3706_v15  ;;  %v5192_v1 = vrot.slane %v3896_v54, %v3690_v7 }
  0x5f   :  { %v1503_v59 = vcombine.low %v5191_v16, %v5190_v32  ;;  %v1500_v38 = vrot.slane %v1486_v31, %v3706_v15  ;;  %v5193_v5 = vrot.slane %v3896_v54, %v3688_v6  ;;  %v4456_v56 = vcombine.low %v1476_v57, %v1483_v47 }
  0x60   :  { %v1510_v28 = vrot.slane %v1502_v34, %v3706_v15  ;;  %v5194_v42 = vrot.slane %v3896_v54, %v3694_v9  ;;  %v5195_v46 = vrot.slane %v3896_v54, %v3692_v8  ;;  %v5196_v22 = vrot.slane %v3896_v54, %v3700_v12 }
  0x61   :  { %v1519_v26 = vcombine.low %v5193_v5, %v5192_v1  ;;  %v1517_v58 = vrot.slane %v1503_v59, %v3706_v15  ;;  %v4466_v31 = vcombine.low %v1493_v17, %v1500_v38  ;;  %v5197_v57 = vrot.slane %v3896_v54, %v3696_v10 }
  0x62   :  { %v1520_v27 = vcombine.low %v5195_v46, %v5194_v42  ;;  %v5198_v34 = vrot.slane %v3896_v54, %v3704_v14  ;;  %v5199_v32 = vrot.slane %v3896_v54, %v3702_v13  ;;  %v5200_v38 = vrot.slane %v3914_v55, %v3690_v7 }
  0x63   :  { %v1527_v60 = vrot.slane %v1519_v26, %v3706_v15  ;;  %v1536_v47 = vcombine.low %v5197_v57, %v5196_v22  ;;  %v4481_v59 = vcombine.low %v1510_v28, %v1517_v58  ;;  %v5201_v1 = vrot.slane %v3914_v55, %v3688_v6 }
  0x64   :  { %v1537_v16 = vcombine.low %v5199_v32, %v5198_v34  ;;  %v1534_v17 = vrot.slane %v1520_v27, %v3706_v15  ;;  %v5202_v26 = vrot.slane %v3914_v55, %v3694_v9  ;;  %v5203_v42 = vrot.slane %v3914_v55, %v3692_v8 }
  0x65   :  { %v1553_v5 = vcombine.low %v5201_v1, %v5200_v38  ;;  %v1544_v54 = vrot.slane %v1536_v47, %v3706_v15  ;;  %v5204_v58 = vrot.slane %v3914_v55, %v3700_v12  ;;  %v5205_v27 = vrot.slane %v3914_v55, %v3696_v10 }
  0x66   :  { %v1554_v46 = vcombine.low %v5203_v42, %v5202_v26  ;;  %v1551_v28 = vrot.slane %v1537_v16, %v3706_v15  ;;  %v5206_v57 = vrot.slane %v3914_v55, %v3704_v14  ;;  %v5207_v34 = vrot.slane %v3914_v55, %v3702_v13 }
  0x67   :  { %v1570_v22 = vcombine.low %v5205_v27, %v5204_v58  ;;  %v4510_v38 = vcombine.low %v1527_v60, %v1534_v17  ;;  %v1561_v47 = vrot.slane %v1553_v5, %v3706_v15  ;;  %v5208_v1 = vrot.slane %v3932_v52, %v3690_v7 }
  0x68   :  { %v1571_v32 = vcombine.low %v5207_v34, %v5206_v57  ;;  %v1568_v16 = vrot.slane %v1554_v46, %v3706_v15  ;;  %v5209_v26 = vrot.slane %v3932_v52, %v3688_v6  ;;  %v4520_v58 = vcombine.low %v1544_v54, %v1551_v28 }
  0x69   :  { %v1578_v27 = vrot.slane %v1570_v22, %v3706_v15  ;;  %v5211_v60 = vrot.slane %v3932_v52, %v3694_v9  ;;  %v5212_v17 = vrot.slane %v3932_v52, %v3692_v8  ;;  %v5214_v34 = vrot.slane %v3932_v52, %v3700_v12 }
  0x6a   :  { %v1587_v42 = vcombine.low %v5209_v26, %v5208_v1  ;;  %5210 = vst [vmem:[#allocation10_spill] sm:$0xff] %v4520_v58  ;;  %v1585_v55 = vrot.slane %v1571_v32, %v3706_v15  ;;  %v4530_v46 = vcombine.low %v1561_v47, %v1568_v16  ;;  %v5215_v54 = vrot.slane %v3932_v52, %v3696_v10 }
  0x6b   :  { %v1588_v5 = vcombine.low %v5212_v17, %v5211_v60  ;;  %v5216_v22 = vrot.slane %v3932_v52, %v3704_v14  ;;  %v5217_v32 = vrot.slane %v3932_v52, %v3702_v13  ;;  %v5219_v16 = vrot.slane %v3950_v53, %v3690_v7 }
  0x6c   :  { %5213 = vst [vmem:[#allocation11_spill] sm:$0xff] %v4530_v46  ;;  %v1595_v57 = vrot.slane %v1587_v42, %v3706_v15  ;;  %v1604_v28 = vcombine.low %v5215_v54, %v5214_v34  ;;  %v4545_v26 = vcombine.low %v1578_v27, %v1585_v55  ;;  %v5220_v42 = vrot.slane %v3950_v53, %v3688_v6 }
  0x6d   :  { %v1605_v1 = vcombine.low %v5217_v32, %v5216_v22  ;;  %v1602_v47 = vrot.slane %v1588_v5, %v3706_v15  ;;  %v5221_v17 = vrot.slane %v3950_v53, %v3694_v9  ;;  %v5222_v34 = vrot.slane %v3950_v53, %v3692_v8 }
  0x6e   :  { %5218 = vst [vmem:[#allocation12_spill] sm:$0xff] %v4545_v26  ;;  %v1621_v60 = vcombine.low %v5220_v42, %v5219_v16  ;;  %v1612_v52 = vrot.slane %v1604_v28, %v3706_v15  ;;  %v5223_v55 = vrot.slane %v3950_v53, %v3700_v12  ;;  %v5224_v5 = vrot.slane %v3950_v53, %v3696_v10 }
  0x6f   :  { %v1622_v54 = vcombine.low %v5222_v34, %v5221_v17  ;;  %v1619_v27 = vrot.slane %v1605_v1, %v3706_v15  ;;  %v5225_v32 = vrot.slane %v3950_v53, %v3704_v14  ;;  %v5226_v16 = vrot.slane %v3950_v53, %v3702_v13 }
  0x70   :  { %v1638_v22 = vcombine.low %v5224_v5, %v5223_v55  ;;  %v4574_v2 = vcombine.low %v1595_v57, %v1602_v47  ;;  %v1629_v28 = vrot.slane %v1621_v60, %v3706_v15  ;;  %v5228_v17 = vrot.slane %v3968_v50, %v3690_v7 }
  0x71   :  { %v1639_v42 = vcombine.low %v5226_v16, %v5225_v32  ;;  %v1636_v1 = vrot.slane %v1622_v54, %v3706_v15  ;;  %v5229_v34 = vrot.slane %v3968_v50, %v3688_v6  ;;  %v4584_v5 = vcombine.low %v1612_v52, %v1619_v27 }
  0x72   :  { %5227 = vst [vmem:[#allocation13_spill] sm:$0xff] %v4574_v2  ;;  %v1646_v18 = vrot.slane %v1638_v22, %v3706_v15  ;;  %v5231_v57 = vrot.slane %v3968_v50, %v3694_v9  ;;  %v5232_v47 = vrot.slane %v3968_v50, %v3692_v8  ;;  %v5234_v16 = vrot.slane %v3968_v50, %v3700_v12 }
  0x73   :  { %v1655_v55 = vcombine.low %v5229_v34, %v5228_v17  ;;  %5230 = vst [vmem:[#allocation14_spill] sm:$0xff] %v4584_v5  ;;  %v1653_v53 = vrot.slane %v1639_v42, %v3706_v15  ;;  %v4594_v54 = vcombine.low %v1629_v28, %v1636_v1  ;;  %v5235_v52 = vrot.slane %v3968_v50, %v3696_v10 }
  0x74   :  { %v1656_v60 = vcombine.low %v5232_v47, %v5231_v57  ;;  %v5236_v22 = vrot.slane %v3968_v50, %v3704_v14  ;;  %v5237_v42 = vrot.slane %v3968_v50, %v3702_v13  ;;  %v5239_v1 = vrot.slane %v3986_v51, %v3690_v7 }
  0x75   :  { %5233 = vst [vmem:[#allocation15_spill] sm:$0xff] %v4594_v54  ;;  %v1663_v32 = vrot.slane %v1655_v55, %v3706_v15  ;;  %v1672_v27 = vcombine.low %v5235_v52, %v5234_v16  ;;  %v4609_v34 = vcombine.low %v1646_v18, %v1653_v53  ;;  %v5240_v55 = vrot.slane %v3986_v51, %v3688_v6 }
  0x76   :  { %v1673_v17 = vcombine.low %v5237_v42, %v5236_v22  ;;  %v1670_v28 = vrot.slane %v1656_v60, %v3706_v15  ;;  %v5241_v47 = vrot.slane %v3986_v51, %v3694_v9  ;;  %v5242_v16 = vrot.slane %v3986_v51, %v3692_v8 }
  0x77   :  { %5238 = vst [vmem:[#allocation16_spill] sm:$0xff] %v4609_v34  ;;  %v1689_v57 = vcombine.low %v5240_v55, %v5239_v1  ;;  %v1680_v50 = vrot.slane %v1672_v27, %v3706_v15  ;;  %v5243_v53 = vrot.slane %v3986_v51, %v3700_v12  ;;  %v5244_v60 = vrot.slane %v3986_v51, %v3696_v10  ;;  %v94_v34 = vld [vmem:[#allocation4 + $0x10] sm:$0xff] }
  0x78   :  { %v1690_v52 = vcombine.low %v5242_v16, %v5241_v47  ;;  %v1687_v18 = vrot.slane %v1673_v17, %v3706_v15  ;;  %v5245_v42 = vrot.slane %v3986_v51, %v3704_v14  ;;  %v5246_v1 = vrot.slane %v3986_v51, %v3702_v13 }
  0x79   :  { %v1706_v22 = vcombine.low %v5244_v60, %v5243_v53  ;;  %v4638_v62 = vcombine.low %v1663_v32, %v1670_v28  ;;  %v1697_v27 = vrot.slane %v1689_v57, %v3706_v15  ;;  %v5248_v47 = vrot.slane %v4004_v48, %v3690_v7 }
  0x7a   :  { %v1707_v55 = vcombine.low %v5246_v1, %v5245_v42  ;;  %v1704_v17 = vrot.slane %v1690_v52, %v3706_v15  ;;  %v5249_v16 = vrot.slane %v4004_v48, %v3688_v6  ;;  %v4648_v60 = vcombine.low %v1680_v50, %v1687_v18 }
  0x7b   :  { %5247 = vst [vmem:[#allocation17_spill] sm:$0xff] %v4638_v62  ;;  %v1714_v63 = vrot.slane %v1706_v22, %v3706_v15  ;;  %v5251_v32 = vrot.slane %v4004_v48, %v3694_v9  ;;  %v5252_v28 = vrot.slane %v4004_v48, %v3692_v8  ;;  %v5254_v1 = vrot.slane %v4004_v48, %v3700_v12 }
  0x7c   :  { %v1723_v53 = vcombine.low %v5249_v16, %v5248_v47  ;;  %5250 = vst [vmem:[#allocation18_spill] sm:$0xff] %v4648_v60  ;;  %v1721_v51 = vrot.slane %v1707_v55, %v3706_v15  ;;  %v4658_v52 = vcombine.low %v1697_v27, %v1704_v17  ;;  %v5255_v50 = vrot.slane %v4004_v48, %v3696_v10 }
  0x7d   :  { %v1724_v57 = vcombine.low %v5252_v28, %v5251_v32  ;;  %v5256_v22 = vrot.slane %v4004_v48, %v3704_v14  ;;  %v5257_v55 = vrot.slane %v4004_v48, %v3702_v13  ;;  %v5259_v17 = vrot.slane %v4022_v49, %v3688_v6 }
  0x7e   :  { %5253 = vst [vmem:[#allocation19_spill] sm:$0xff] %v4658_v52  ;;  %v1731_v42 = vrot.slane %v1723_v53, %v3706_v15  ;;  %v1740_v18 = vcombine.low %v5255_v50, %v5254_v1  ;;  %v4673_v16 = vcombine.low %v1714_v63, %v1721_v51  ;;  %v5260_v32 = vrot.slane %v4022_v49, %v3694_v9 }
  0x7f   :  { %v1741_v47 = vcombine.low %v5257_v55, %v5256_v22  ;;  %v1738_v27 = vrot.slane %v1724_v57, %v3706_v15  ;;  %v1757_v53 = vcombine.low %v5259_v17, %v934_v61  ;;  %v5261_v28 = vrot.slane %v4022_v49, %v3692_v8 }
  0x80   :  { %5258 = vst [vmem:[#allocation20_spill] sm:$0xff] %v4673_v16  ;;  %v1748_v48 = vrot.slane %v1740_v18, %v3706_v15  ;;  %v5262_v51 = vrot.slane %v4022_v49, %v3700_v12  ;;  %v5263_v57 = vrot.slane %v4022_v49, %v3696_v10  ;;  %v5264_v61 = vrot.slane %v4022_v49, %v3704_v14 }
  0x81   :  { %v1758_v1 = vcombine.low %v5261_v28, %v5260_v32  ;;  %v1755_v63 = vrot.slane %v1741_v47, %v3706_v15  ;;  %v5265_v22 = vrot.slane %v4022_v49, %v3702_v13  ;;  %v4702_v17 = vcombine.low %v1731_v42, %v1738_v27 }
  0x82   :  { %v1774_v50 = vcombine.low %v5263_v57, %v5262_v51  ;;  %v1765_v18 = vrot.slane %v1757_v53, %v3706_v15  ;;  %v5267_v32 = vrot.slane %v4040_v45, %v3690_v7  ;;  %v5268_v28 = vrot.slane %v4040_v45, %v3688_v6 }
  0x83   :  { %v1775_v55 = vcombine.low %v5265_v22, %v5264_v61  ;;  %5266 = vst [vmem:[#allocation21_spill] sm:$0xff] %v4702_v17  ;;  %v1772_v47 = vrot.slane %v1758_v1, %v3706_v15  ;;  %v4712_v57 = vcombine.low %v1748_v48, %v1755_v63  ;;  %v5270_v42 = vrot.slane %v4040_v45, %v3694_v9 }
  0x84   :  { %v1791_v51 = vcombine.low %v5268_v28, %v5267_v32  ;;  %v1782_v16 = vrot.slane %v1774_v50, %v3706_v15  ;;  %v5271_v27 = vrot.slane %v4040_v45, %v3692_v8  ;;  %v141_v50 = vld [vmem:[#allocation6] sm:$0xff] }
  0x85   :  { %5269 = vst [vmem:[#allocation22_spill] sm:$0xff] %v4712_v57  ;;  %v1789_v49 = vrot.slane %v1775_v55, %v3706_v15  ;;  %v4722_v1 = vcombine.low %v1765_v18, %v1772_v47  ;;  %v194_v55 = vrot.slane %v141_v50, %v3688_v6  ;;  %v198_v32 = vrot.slane %v141_v50, %v3690_v7 }
  0x86   :  { %v1792_v53 = vcombine.low %v5271_v27, %v5270_v42  ;;  %v1799_v61 = vrot.slane %v1791_v51, %v3706_v15  ;;  %v202_v28 = vrot.slane %v141_v50, %v3692_v8  ;;  %v206_v45 = vrot.slane %v141_v50, %v3694_v9 }
  0x87   :  { %5272 = vst [vmem:[#allocation23_spill] sm:$0xff] %v4722_v1  ;;  %v4725_v22 = vcombine.low %v1782_v16, %v1789_v49  ;;  %v975_v42 = vcombine.low %v194_v55, %v198_v32  ;;  %v210_v47 = vrot.slane %v141_v50, %v3696_v10  ;;  %v214_v16 = vrot.slane %v141_v50, %v3700_v12  ;;  %v92_v1 = vld [vmem:[#allocation4] sm:$0xff] }
  0x88   :  { %v1806_v48 = vrot.slane %v1792_v53, %v3706_v15  ;;  %v976_v18 = vcombine.low %v202_v28, %v206_v45  ;;  %v218_v51 = vrot.slane %v141_v50, %v3702_v13  ;;  %v222_v49 = vrot.slane %v141_v50, %v3704_v14 }
  0x89   :  { %5273 = vst [vmem:[#allocation24_spill] sm:$0xff] %v4725_v22  ;;  %v983_v27 = vrot.slane %v975_v42, %v3706_v15 }
  0x8a   :  { %v4728_v63 = vcombine.low %v1799_v61, %v1806_v48  ;;  %v990_v53 = vrot.slane %v976_v18, %v3706_v15  ;;  %v142_v61 = vld [vmem:[#allocation6 + $0x8] sm:$0xff]  ;;  %v992_v48 = vcombine.low %v210_v47, %v214_v16  ;;  %v93_v16 = vld [vmem:[#allocation4 + $0x8] sm:$0xff] }
  0x8b   :  { %v226_v55 = vrot.slane %v142_v61, %v3688_v6  ;;  %v230_v32 = vrot.slane %v142_v61, %v3690_v7  ;;  %v234_v28 = vrot.slane %v142_v61, %v3692_v8  ;;  %v238_v45 = vrot.slane %v142_v61, %v3694_v9 }
  0x8c   :  { %5274 = vst [vmem:[#allocation25_spill] sm:$0xff] %v4728_v63  ;;  %v993_v63 = vcombine.low %v218_v51, %v222_v49  ;;  %v991_v22 = vcombine.low %v983_v27, %v990_v53  ;;  %v1000_v57 = vrot.slane %v992_v48, %v3706_v15  ;;  %v242_v49 = vrot.slane %v142_v61, %v3696_v10 }
  0x8d   :  { %v1009_v18 = vcombine.low %v226_v55, %v230_v32  ;;  %v1010_v52 = vcombine.low %v234_v28, %v238_v45  ;;  %v246_v27 = vrot.slane %v142_v61, %v3700_v12  ;;  %v250_v53 = vrot.slane %v142_v61, %v3702_v13 }
  0x8e   :  { %v1007_v50 = vrot.slane %v993_v63, %v3706_v15  ;;  %v1857_v42 = vmul.f32 %v991_v22, %v92_v1  ;;  %v254_v60 = vrot.slane %v142_v61, %v3704_v14  ;;  %v143_v22 = vld [vmem:[#allocation6 + $0x10] sm:$0xff] }
  0x8f   :  { %v1017_v48 = vrot.slane %v1009_v18, %v3706_v15  ;;  %v1024_v63 = vrot.slane %v1010_v52, %v3706_v15  ;;  %v1026_v32 = vcombine.low %v242_v49, %v246_v27  ;;  %v258_v61 = vrot.slane %v143_v22, %v3688_v6 }
  0x90   :  { %v1008_v17 = vcombine.low %v1000_v57, %v1007_v50  ;;  %v2154_v47 = vcombine.high %v1857_v42, %v1857_v42  ;;  %v2161_v51 = vrot.slane %v1857_v42, %v3706_v15  ;;  %v1027_v28 = vcombine.low %v250_v53, %v254_v60 }
  0x91   :  { %v1025_v45 = vcombine.low %v1017_v48, %v1024_v63  ;;  %v262_v52 = vrot.slane %v143_v22, %v3690_v7  ;;  %v270_v60 = vrot.slane %v143_v22, %v3694_v9  ;;  %v1034_v49 = vrot.slane %v1026_v32, %v3706_v15 }
  0x92   :  { %v1858_v1 = vmul.f32 %v1008_v17, %v93_v16  ;;  %v2168_v57 = vrot.slane %v2154_v47, %v3706_v15  ;;  %v2169_v55 = vcombine.high %v2161_v51, %v2161_v51  ;;  %v3184_v18 = vsel %vm3183_vm0, %v2161_v51, 0.0 }
  0x93   :  { %v266_v17 = vrot.slane %v143_v22, %v3692_v8  ;;  %v1041_v27 = vrot.slane %v1027_v28, %v3706_v15  ;;  %v1859_v48 = vmul.f32 %v1025_v45, %v94_v34  ;;  %v274_v45 = vrot.slane %v143_v22, %v3696_v10 }
  0x94   :  { %v2170_v50 = vcombine.high %v2168_v57, %v2168_v57  ;;  %v2171_v42 = vcombine.high %v1858_v1, %v1858_v1  ;;  %v2178_v62 = vrot.slane %v1858_v1, %v3706_v15  ;;  %v3185_v47 = vsel %vm3183_vm0, %v2169_v55, 0.0 }
  0x95   :  { %v3187_v16 = vsel %vm3183_vm0, %v2168_v57, 0.0  ;;  %v3186_v53 = vadd.f32 %v3185_v47, %v3184_v18  ;;  %v1042_v2 = vcombine.low %v1034_v49, %v1041_v27  ;;  %v1043_v55 = vcombine.low %v258_v61, %v262_v52  ;;  %v95_v18 = vld [vmem:[#allocation4 + $0x18] sm:$0xff] }
  0x96   :  { %v2185_v63 = vrot.slane %v2171_v42, %v3706_v15  ;;  %v2186_v1 = vcombine.high %v2178_v62, %v2178_v62  ;;  %v3189_v51 = vsel %vm3183_vm0, %v2170_v50, 0.0  ;;  %v3191_v5 = vsel %vm3183_vm0, %v2178_v62, 0.0 }
  0x97   :  { %v3188_v54 = vadd.f32 %v3187_v16, %v3186_v53  ;;  %v1044_v26 = vcombine.low %v266_v17, %v270_v60  ;;  %v2188_v58 = vcombine.high %v1859_v48, %v1859_v48  ;;  %v2195_v32 = vrot.slane %v1859_v48, %v3706_v15  ;;  %v144_v53 = vld [vmem:[#allocation6 + $0x18] sm:$0xff] }
  0x98   :  { %v2187_v46 = vcombine.high %v2185_v63, %v2185_v63  ;;  %v3193_v28 = vsel %vm3183_vm0, %v2186_v1, 0.0  ;;  %v278_v42 = vrot.slane %v143_v22, %v3700_v12  ;;  %v282_v50 = vrot.slane %v143_v22, %v3702_v13 }
  0x99   :  { %v3190_v57 = vadd.f32 %v3189_v51, %v3188_v54  ;;  %v3195_v62 = vsel %vm3183_vm0, %v2185_v63, 0.0  ;;  %v286_v61 = vrot.slane %v143_v22, %v3704_v14  ;;  %v1051_v54 = vrot.slane %v1043_v55, %v3706_v15 }
  0x9a   :  { %v1058_v52 = vrot.slane %v1044_v26, %v3706_v15  ;;  %v1860_v47 = vmul.f32 %v1042_v2, %v95_v18  ;;  %v2202_v16 = vrot.slane %v2188_v58, %v3706_v15  ;;  %v2203_v60 = vcombine.high %v2195_v32, %v2195_v32  ;;  %v96_v2 = vld [vmem:[#allocation4 + $0x20] sm:$0xff] }
  0x9b   :  { %v3192_v34 = vadd.f32 %v3191_v5, %v3190_v57  ;;  %v3197_v5 = vsel %vm3183_vm0, %v2187_v46, 0.0  ;;  %v3199_v27 = vsel %vm3183_vm0, %v2195_v32, 0.0  ;;  %v1060_v1 = vcombine.low %v274_v45, %v278_v42 }
  0x9c   :  { %v1059_v48 = vcombine.low %v1051_v54, %v1058_v52  ;;  %v1061_v63 = vcombine.low %v282_v50, %v286_v61  ;;  %v2204_v22 = vcombine.high %v2202_v16, %v2202_v16  ;;  %v2205_v57 = vcombine.high %v1860_v47, %v1860_v47 }
  0x9d   :  { %v3194_v17 = vadd.f32 %v3193_v28, %v3192_v34  ;;  %v2212_v55 = vrot.slane %v1860_v47, %v3706_v15  ;;  %v3201_v26 = vsel %vm3183_vm0, %v2203_v60, 0.0  ;;  %v290_v58 = vrot.slane %v144_v53, %v3688_v6 }
  0x9e   :  { %v294_v46 = vrot.slane %v144_v53, %v3690_v7  ;;  %v298_v18 = vrot.slane %v144_v53, %v3692_v8  ;;  %v3203_v32 = vsel %vm3183_vm0, %v2202_v16, 0.0  ;;  %v302_v34 = vrot.slane %v144_v53, %v3694_v9 }
  0x9f   :  { %v3196_v49 = vadd.f32 %v3195_v62, %v3194_v17  ;;  %v1068_v45 = vrot.slane %v1060_v1, %v3706_v15  ;;  %v1075_v42 = vrot.slane %v1061_v63, %v3706_v15  ;;  %v1861_v62 = vmul.f32 %v1059_v48, %v96_v2 }
  0xa0   :  { %v2219_v61 = vrot.slane %v2205_v57, %v3706_v15  ;;  %v2220_v54 = vcombine.high %v2212_v55, %v2212_v55  ;;  %v3205_v52 = vsel %vm3183_vm0, %v2204_v22, 0.0  ;;  %v3207_v7 = vsel %vm3183_vm0, %v2212_v55, 0.0 }
  0xa1   :  { %v3198_v51 = vadd.f32 %v3197_v5, %v3196_v49  ;;  %v1076_v17 = vcombine.low %v1068_v45, %v1075_v42  ;;  %v1077_v8 = vcombine.low %v290_v58, %v294_v46  ;;  %v1078_v47 = vcombine.low %v298_v18, %v302_v34 }
  0xa2   :  { %v2221_v60 = vcombine.high %v2219_v61, %v2219_v61  ;;  %v2222_v9 = vcombine.high %v1861_v62, %v1861_v62  ;;  %v2229_v5 = vrot.slane %v1861_v62, %v3706_v15  ;;  %v3209_v49 = vsel %vm3183_vm0, %v2220_v54, 0.0  ;;  %v98_v62 = vld [vmem:[#allocation4 + $0x30] sm:$0xff] }
  0xa3   :  { %v3200_v28 = vadd.f32 %v3199_v27, %v3198_v51  ;;  %v97_v27 = vld [vmem:[#allocation4 + $0x28] sm:$0xff]  ;;  %v306_v1 = vrot.slane %v144_v53, %v3696_v10  ;;  %v310_v63 = vrot.slane %v144_v53, %v3700_v12  ;;  %v314_v51 = vrot.slane %v144_v53, %v3702_v13 }
  0xa4   :  { %v3211_v22 = vsel %vm3183_vm0, %v2219_v61, 0.0  ;;  %v318_v57 = vrot.slane %v144_v53, %v3704_v14  ;;  %v1085_v55 = vrot.slane %v1077_v8, %v3706_v15  ;;  %v2236_v58 = vrot.slane %v2222_v9, %v3706_v15 }
  0xa5   :  { %v3202_v50 = vadd.f32 %v3201_v26, %v3200_v28  ;;  %v1092_v26 = vrot.slane %v1078_v47, %v3706_v15  ;;  %v1862_v28 = vmul.f32 %v1076_v17, %v97_v27  ;;  %v2237_v46 = vcombine.high %v2229_v5, %v2229_v5 }
  0xa6   :  { %v3213_v18 = vsel %vm3183_vm0, %v2221_v60, 0.0  ;;  %v3215_v12 = vsel %vm3183_vm0, %v2229_v5, 0.0  ;;  %v1094_v13 = vcombine.low %v306_v1, %v310_v63  ;;  %v1095_v34 = vcombine.low %v314_v51, %v318_v57  ;;  %v99_v51 = vld [vmem:[#allocation4 + $0x38] sm:$0xff] }
  0xa7   :  { %v3204_v6 = vadd.f32 %v3203_v32, %v3202_v50  ;;  %v1093_v32 = vcombine.low %v1085_v55, %v1092_v26  ;;  %v2238_v42 = vcombine.high %v2236_v58, %v2236_v58  ;;  %v2239_v14 = vcombine.high %v1862_v28, %v1862_v28 }
  0xa8   :  { %v2246_v53 = vrot.slane %v1862_v28, %v3706_v15  ;;  %v3217_v50 = vsel %vm3183_vm0, %v2237_v46, 0.0  ;;  %v3219_v54 = vsel %vm3183_vm0, %v2236_v58, 0.0 }
  0xa9   :  { %v3206_v16 = vadd.f32 %v3205_v52, %v3204_v6  ;;  %v1102_v52 = vrot.slane %v1094_v13, %v3706_v15  ;;  %v1109_v6 = vrot.slane %v1095_v34, %v3706_v15  ;;  %v1863_v17 = vmul.f32 %v1093_v32, %v98_v62 }
  0xaa   :  { %v2253_v8 = vrot.slane %v2239_v14, %v3706_v15  ;;  %v2254_v47 = vcombine.high %v2246_v53, %v2246_v53  ;;  %v3223_v9 = vsel %vm3183_vm0, %v2246_v53, 0.0 }
  0xab   :  { %v3208_v48 = vadd.f32 %v3207_v7, %v3206_v16  ;;  %v3221_v16 = vsel %vm3183_vm0, %v2238_v42, 0.0  ;;  %v1110_v5 = vcombine.low %v1102_v52, %v1109_v6  ;;  %v2263_v1 = vrot.slane %v1863_v17, %v3706_v15 }
  0xac   :  { %v2255_v27 = vcombine.high %v2253_v8, %v2253_v8  ;;  %v3225_v63 = vsel %vm3183_vm0, %v2254_v47, 0.0  ;;  %v3227_v57 = vsel %vm3183_vm0, %v2253_v8, 0.0 }
  0xad   :  { %v3210_v2 = vadd.f32 %v3209_v49, %v3208_v48  ;;  %v2256_v48 = vcombine.high %v1863_v17, %v1863_v17  ;;  %v1864_v26 = vmul.f32 %v1110_v5, %v99_v51  ;;  %v2271_v28 = vcombine.high %v2263_v1, %v2263_v1 }
  0xae   :  { %v3229_v58 = vsel %vm3183_vm0, %v2255_v27, 0.0 }
  0xaf   :  { %v3212_v10 = vadd.f32 %v3211_v22, %v3210_v2  ;;  %v2270_v2 = vrot.slane %v2256_v48, %v3706_v15  ;;  %v2273_v32 = vcombine.high %v1864_v26, %v1864_v26  ;;  %v2280_v13 = vrot.slane %v1864_v26, %v3706_v15 }
  0xb0   :  { %v3233_v34 = vsel %vm3183_vm0, %v2271_v28, 0.0  ;;  %v102_v28 = vld [vmem:[#allocation4 + $0x50] sm:$0xff] }
  0xb1   :  { %v3214_v45 = vadd.f32 %v3213_v18, %v3212_v10  ;;  %v3231_v18 = vsel %vm3183_vm0, %v2263_v1, 0.0  ;;  %v3235_v14 = vsel %vm3183_vm0, %v2270_v2, 0.0  ;;  %v2287_v62 = vrot.slane %v2273_v32, %v3706_v15 }
  0xb2   :  { %v3239_v6 = vsel %vm3183_vm0, %v2280_v13, 0.0 }
  0xb3   :  { %v3216_v61 = vadd.f32 %v3215_v12, %v3214_v45  ;;  %v2272_v12 = vcombine.high %v2270_v2, %v2270_v2  ;;  %v100_v45 = vld [vmem:[#allocation4 + $0x40] sm:$0xff]  ;;  %v2289_v17 = vcombine.high %v2287_v62, %v2287_v62  ;;  %v3243_v5 = vsel %vm3183_vm0, %v2287_v62, 0.0  ;;  %v103_v62 = vld [vmem:[#allocation4 + $0x58] sm:$0xff] }
  0xb5   :  { %v3218_v7 = vadd.f32 %v3217_v50, %v3216_v61  ;;  %v1865_v50 = vmul.f32 %v4126_v25, %v100_v45  ;;  %v2288_v61 = vcombine.high %v2280_v13, %v2280_v13  ;;  %v3245_v1 = vsel %vm3183_vm0, %v2289_v17, 0.0 }
  0xb7   :  { %v3220_v60 = vadd.f32 %v3219_v54, %v3218_v7  ;;  %v3237_v54 = vsel %vm3183_vm0, %v2272_v12, 0.0  ;;  %v2290_v8 = vcombine.high %v1865_v50, %v1865_v50  ;;  %v2297_v47 = vrot.slane %v1865_v50, %v3706_v15 }
  0xb9   :  { %v3222_v49 = vadd.f32 %v3221_v16, %v3220_v60  ;;  %v3241_v16 = vsel %vm3183_vm0, %v2288_v61, 0.0  ;;  %v101_v60 = vld [vmem:[#allocation4 + $0x48] sm:$0xff]  ;;  %v2304_v27 = vrot.slane %v2290_v8, %v3706_v15  ;;  %v2305_v48 = vcombine.high %v2297_v47, %v2297_v47 }
  0xba   :  { %v3247_v51 = vsel %vm3183_vm0, %v2297_v47, 0.0 }
  0xbb   :  { %v3224_v22 = vadd.f32 %v3223_v9, %v3222_v49  ;;  %v1866_v49 = vmul.f32 %v4136_v30, %v101_v60  ;;  %v3249_v2 = vsel %vm3183_vm0, %v2305_v48, 0.0 }
  0xbd   :  { %v3226_v55 = vadd.f32 %v3225_v63, %v3224_v22  ;;  %v2314_v26 = vrot.slane %v1866_v49, %v3706_v15 }
  0xbf   :  { %v3228_v46 = vadd.f32 %v3227_v57, %v3226_v55  ;;  %v2306_v57 = vcombine.high %v2304_v27, %v2304_v27  ;;  %v2307_v55 = vcombine.high %v1866_v49, %v1866_v49  ;;  %v2322_v12 = vcombine.high %v2314_v26, %v2314_v26  ;;  %v104_v49 = vld [vmem:[#allocation4 + $0x60] sm:$0xff] }
  0xc1   :  { %v3230_v10 = vadd.f32 %v3229_v58, %v3228_v46  ;;  %v3251_v46 = vsel %vm3183_vm0, %v2304_v27, 0.0  ;;  %v3253_v32 = vsel %vm3183_vm0, %v2306_v57, 0.0  ;;  %v3257_v50 = vsel %vm3183_vm0, %v2322_v12, 0.0 }
  0xc3   :  { %v3232_v42 = vadd.f32 %v3231_v18, %v3230_v10  ;;  %v1867_v18 = vmul.f32 %v4146_v33, %v102_v28  ;;  %v2321_v10 = vrot.slane %v2307_v55, %v3706_v15 }
  0xc5   :  { %v3234_v53 = vadd.f32 %v3233_v34, %v3232_v42  ;;  %v3255_v34 = vsel %vm3183_vm0, %v2314_v26, 0.0  ;;  %v2323_v42 = vcombine.high %v2321_v10, %v2321_v10 }
  0xc7   :  { %v3236_v52 = vadd.f32 %v3235_v14, %v3234_v53  ;;  %v2324_v14 = vcombine.high %v1867_v18, %v1867_v18  ;;  %v2331_v53 = vrot.slane %v1867_v18, %v3706_v15  ;;  %v3261_v17 = vsel %vm3183_vm0, %v2323_v42, 0.0 }
  0xc9   :  { %v3238_v7 = vadd.f32 %v3237_v54, %v3236_v52  ;;  %v3259_v54 = vsel %vm3183_vm0, %v2321_v10, 0.0  ;;  %v1868_v52 = vmul.f32 %v4161_v3, %v103_v62  ;;  %v3263_v47 = vsel %vm3183_vm0, %v2331_v53, 0.0 }
  0xcb   :  { %v3240_v9 = vadd.f32 %v3239_v6, %v3238_v7  ;;  %v2338_v6 = vrot.slane %v2324_v14, %v3706_v15  ;;  %v2339_v7 = vcombine.high %v2331_v53, %v2331_v53 }
  0xcd   :  { %v3242_v25 = vadd.f32 %v3241_v16, %v3240_v9  ;;  %v2340_v60 = vcombine.high %v2338_v6, %v2338_v6  ;;  %v2341_v9 = vcombine.high %v1868_v52, %v1868_v52  ;;  %v3267_v48 = vsel %vm3183_vm0, %v2338_v6, 0.0 }
  0xcf   :  { %v3244_v63 = vadd.f32 %v3243_v5, %v3242_v25  ;;  %v2348_v5 = vrot.slane %v1868_v52, %v3706_v15  ;;  %v3265_v25 = vsel %vm3183_vm0, %v2339_v7, 0.0 }
  0xd1   :  { %v3246_v22 = vadd.f32 %v3245_v1, %v3244_v63  ;;  %v1869_v1 = vmul.f32 %v4190_v4, %v104_v49  ;;  %v2355_v63 = vrot.slane %v2341_v9, %v3706_v15  ;;  %v3271_v55 = vsel %vm3183_vm0, %v2348_v5, 0.0 }
  0xd3   :  { %v3248_v58 = vadd.f32 %v3247_v51, %v3246_v22  ;;  %v2356_v51 = vcombine.high %v2348_v5, %v2348_v5  ;;  %v3269_v22 = vsel %vm3183_vm0, %v2340_v60, 0.0  ;;  %v2358_v28 = vcombine.high %v1869_v1, %v1869_v1 }
  0xd4   :  { %v3275_v10 = vsel %vm3183_vm0, %v2355_v63, 0.0 }
  0xd5   :  { %v3250_v30 = vadd.f32 %v3249_v2, %v3248_v58  ;;  %v2357_v2 = vcombine.high %v2355_v63, %v2355_v63  ;;  %v2365_v58 = vrot.slane %v1869_v1, %v3706_v15 }
  0xd7   :  { %v3252_v13 = vadd.f32 %v3251_v46, %v3250_v30  ;;  %v3273_v46 = vsel %vm3183_vm0, %v2356_v51, 0.0  ;;  %v105_v30 = vld [vmem:[#allocation4 + $0x68] sm:$0xff]  ;;  %v3279_v42 = vsel %vm3183_vm0, %v2365_v58, 0.0 }
  0xd8   :  { %v1870_v12 = vmul.f32 %v4200_v24, %v105_v30  ;;  %v108_v30 = vld [vmem:[#allocation4 + $0x80] sm:$0xff] }
  0xd9   :  { %v3254_v45 = vadd.f32 %v3253_v32, %v3252_v13  ;;  %v2372_v32 = vrot.slane %v2358_v28, %v3706_v15  ;;  %v2373_v13 = vcombine.high %v2365_v58, %v2365_v58 }
  0xda   :  { %v2382_v62 = vrot.slane %v1870_v12, %v3706_v15 }
  0xdb   :  { %v3256_v61 = vadd.f32 %v3255_v34, %v3254_v45  ;;  %v3277_v34 = vsel %vm3183_vm0, %v2357_v2, 0.0  ;;  %v2374_v53 = vcombine.high %v2372_v32, %v2372_v32  ;;  %v3283_v52 = vsel %vm3183_vm0, %v2372_v32, 0.0 }
  0xdd   :  { %v3258_v33 = vadd.f32 %v3257_v50, %v3256_v61  ;;  %v2375_v50 = vcombine.high %v1870_v12, %v1870_v12  ;;  %v3281_v61 = vsel %vm3183_vm0, %v2373_v13, 0.0 }
  0xdf   :  { %v3260_v8 = vadd.f32 %v3259_v54, %v3258_v33  ;;  %v106_v54 = vld [vmem:[#allocation4 + $0x70] sm:$0xff]  ;;  %v2389_v7 = vrot.slane %v2375_v50, %v3706_v15 }
  0xe0   :  { %v1871_v6 = vmul.f32 %v4210_v11, %v106_v54 }
  0xe1   :  { %v3262_v16 = vadd.f32 %v3261_v17, %v3260_v8  ;;  %v2390_v17 = vcombine.high %v2382_v62, %v2382_v62  ;;  %v3285_v8 = vsel %vm3183_vm0, %v2374_v53, 0.0  ;;  %v2391_v9 = vcombine.high %v2389_v7, %v2389_v7 }
  0xe2   :  { %v2392_v5 = vcombine.high %v1871_v6, %v1871_v6 }
  0xe3   :  { %v3264_v27 = vadd.f32 %v3263_v47, %v3262_v16  ;;  %v3287_v16 = vsel %vm3183_vm0, %v2382_v62, 0.0  ;;  %v3289_v49 = vsel %vm3183_vm0, %v2390_v17, 0.0 }
  0xe4   :  { %v2406_v63 = vrot.slane %v2392_v5, %v3706_v15 }
  0xe5   :  { %v3266_v3 = vadd.f32 %v3265_v25, %v3264_v27  ;;  %v2399_v25 = vrot.slane %v1871_v6, %v3706_v15  ;;  %v107_v27 = vld [vmem:[#allocation4 + $0x78] sm:$0xff] }
  0xe6   :  { %v1872_v1 = vmul.f32 %v4225_v40, %v107_v27  ;;  %v2408_v2 = vcombine.high %v2406_v63, %v2406_v63 }
  0xe7   :  { %v3268_v57 = vadd.f32 %v3267_v48, %v3266_v3  ;;  %v3291_v3 = vsel %vm3183_vm0, %v2389_v7, 0.0  ;;  %v2407_v51 = vcombine.high %v2399_v25, %v2399_v25 }
  0xe8   :  { %v2409_v28 = vcombine.high %v1872_v1, %v1872_v1  ;;  %v2416_v58 = vrot.slane %v1872_v1, %v3706_v15  ;;  %v3301_v13 = vsel %vm3183_vm0, %v2408_v2, 0.0 }
  0xe9   :  { %v3270_v26 = vadd.f32 %v3269_v22, %v3268_v57  ;;  %v3293_v22 = vsel %vm3183_vm0, %v2391_v9, 0.0 }
  0xea   :  { %v2423_v12 = vrot.slane %v2409_v28, %v3706_v15  ;;  %v2424_v32 = vcombine.high %v2416_v58, %v2416_v58  ;;  %v111_v28 = vld [vmem:[#allocation4 + $0x98] sm:$0xff] }
  0xeb   :  { %v3272_v18 = vadd.f32 %v3271_v55, %v3270_v26  ;;  %v3295_v55 = vsel %vm3183_vm0, %v2399_v25, 0.0  ;;  %v110_v25 = vld [vmem:[#allocation4 + $0x90] sm:$0xff] }
  0xec   :  { %v3305_v62 = vsel %vm3183_vm0, %v2424_v32, 0.0 }
  0xed   :  { %v3274_v4 = vadd.f32 %v3273_v46, %v3272_v18  ;;  %v3297_v46 = vsel %vm3183_vm0, %v2407_v51, 0.0 }
  0xef   :  { %v3276_v45 = vadd.f32 %v3275_v10, %v3274_v4  ;;  %v3299_v10 = vsel %vm3183_vm0, %v2406_v63, 0.0  ;;  %v1873_v4 = vmul.f32 %v4254_v29, %v108_v30  ;;  %v1876_v30 = vmul.f32 %v4289_v19, %v111_v28 }
  0xf1   :  { %v3278_v14 = vadd.f32 %v3277_v34, %v3276_v45  ;;  %v3303_v45 = vsel %vm3183_vm0, %v2416_v58, 0.0  ;;  %v2426_v53 = vcombine.high %v1873_v4, %v1873_v4  ;;  %v2433_v50 = vrot.slane %v1873_v4, %v3706_v15 }
  0xf3   :  { %v3280_v33 = vadd.f32 %v3279_v42, %v3278_v14  ;;  %v2425_v14 = vcombine.high %v2423_v12, %v2423_v12  ;;  %v2441_v6 = vcombine.high %v2433_v50, %v2433_v50 }
  0xf5   :  { %v3282_v24 = vadd.f32 %v3281_v61, %v3280_v33  ;;  %v109_v61 = vld [vmem:[#allocation4 + $0x88] sm:$0xff]  ;;  %v3307_v33 = vsel %vm3183_vm0, %v2423_v12, 0.0  ;;  %v3309_v7 = vsel %vm3183_vm0, %v2425_v14, 0.0  ;;  %v3313_v5 = vsel %vm3183_vm0, %v2441_v6, 0.0  ;;  %v112_v14 = vld [vmem:[#allocation4 + $0xa0] sm:$0xff] }
  0xf7   :  { %v3284_v47 = vadd.f32 %v3283_v52, %v3282_v24  ;;  %v1874_v52 = vmul.f32 %v4264_v35, %v109_v61  ;;  %v2440_v24 = vrot.slane %v2426_v53, %v3706_v15 }
  0xf9   :  { %v3286_v60 = vadd.f32 %v3285_v8, %v3284_v47  ;;  %v3311_v8 = vsel %vm3183_vm0, %v2433_v50, 0.0  ;;  %v2450_v9 = vrot.slane %v1874_v52, %v3706_v15  ;;  %v3315_v27 = vsel %vm3183_vm0, %v2440_v24, 0.0 }
  0xfb   :  { %v3288_v48 = vadd.f32 %v3287_v16, %v3286_v60  ;;  %v2442_v16 = vcombine.high %v2440_v24, %v2440_v24  ;;  %v2443_v60 = vcombine.high %v1874_v52, %v1874_v52  ;;  %v3319_v51 = vsel %vm3183_vm0, %v2450_v9, 0.0 }
  0xfd   :  { %v3290_v11 = vadd.f32 %v3289_v49, %v3288_v48  ;;  %v1875_v48 = vmul.f32 %v4274_v20, %v110_v25  ;;  %v3317_v1 = vsel %vm3183_vm0, %v2442_v16, 0.0 }
  0xff   :  { %v3292_v57 = vadd.f32 %v3291_v3, %v3290_v11  ;;  %v2457_v3 = vrot.slane %v2443_v60, %v3706_v15  ;;  %v2458_v11 = vcombine.high %v2450_v9, %v2450_v9 }
 0x101   :  { %v3294_v26 = vadd.f32 %v3293_v22, %v3292_v57  ;;  %v2459_v57 = vcombine.high %v2457_v3, %v2457_v3  ;;  %v3321_v2 = vsel %vm3183_vm0, %v2458_v11, 0.0 }
 0x103   :  { %v3296_v18 = vadd.f32 %v3295_v55, %v3294_v26  ;;  %v2460_v55 = vcombine.high %v1875_v48, %v1875_v48  ;;  %v2467_v26 = vrot.slane %v1875_v48, %v3706_v15 }
 0x105   :  { %v3298_v40 = vadd.f32 %v3297_v46, %v3296_v18  ;;  %v3323_v46 = vsel %vm3183_vm0, %v2457_v3, 0.0  ;;  %v2474_v18 = vrot.slane %v2460_v55, %v3706_v15  ;;  %v3327_v12 = vsel %vm3183_vm0, %v2467_v26, 0.0 }
 0x107   :  { %v3300_v34 = vadd.f32 %v3299_v10, %v3298_v40  ;;  %v2475_v10 = vcombine.high %v2467_v26, %v2467_v26  ;;  %v3325_v40 = vsel %vm3183_vm0, %v2459_v57, 0.0  ;;  %v3331_v50 = vsel %vm3183_vm0, %v2474_v18, 0.0 }
 0x109   :  { %v3302_v42 = vadd.f32 %v3301_v13, %v3300_v34  ;;  %v2476_v13 = vcombine.high %v2474_v18, %v2474_v18  ;;  %v2477_v34 = vcombine.high %v1876_v30, %v1876_v30 }
 0x10b   :  { %v3304_v54 = vadd.f32 %v3303_v45, %v3302_v42  ;;  %v2484_v45 = vrot.slane %v1876_v30, %v3706_v15  ;;  %v3329_v42 = vsel %vm3183_vm0, %v2475_v10, 0.0  ;;  %v2491_v61 = vrot.slane %v2477_v34, %v3706_v15 }
 0x10d   :  { %v3306_v29 = vadd.f32 %v3305_v62, %v3304_v54  ;;  %v1877_v62 = vmul.f32 %v4318_v37, %v112_v14  ;;  %v2492_v54 = vcombine.high %v2484_v45, %v2484_v45  ;;  %v3335_v52 = vsel %vm3183_vm0, %v2484_v45, 0.0 }
 0x10e   :  { %v2493_v6 = vcombine.high %v2491_v61, %v2491_v61  ;;  %v3339_v60 = vsel %vm3183_vm0, %v2491_v61, 0.0 }
 0x10f   :  { %v3308_v17 = vadd.f32 %v3307_v33, %v3306_v29  ;;  %v3333_v33 = vsel %vm3183_vm0, %v2476_v13, 0.0 }
 0x111   :  { %v3310_v47 = vadd.f32 %v3309_v7, %v3308_v17  ;;  %v2494_v7 = vcombine.high %v1877_v62, %v1877_v62  ;;  %v2501_v17 = vrot.slane %v1877_v62, %v3706_v15 }
 0x113   :  { %v3312_v49 = vadd.f32 %v3311_v8, %v3310_v47  ;;  %v3337_v8 = vsel %vm3183_vm0, %v2492_v54, 0.0  ;;  %v113_v47 = vld [vmem:[#allocation4 + $0xa8] sm:$0xff]  ;;  %v2509_v25 = vcombine.high %v2501_v17, %v2501_v17 }
 0x114   :  { %v1878_v9 = vmul.f32 %v4328_v44, %v113_v47 }
 0x115   :  { %v3314_v35 = vadd.f32 %v3313_v5, %v3312_v49  ;;  %v2508_v5 = vrot.slane %v2494_v7, %v3706_v15  ;;  %v3341_v49 = vsel %vm3183_vm0, %v2493_v6, 0.0 }
 0x116   :  { %v2511_v11 = vcombine.high %v1878_v9, %v1878_v9 }
 0x117   :  { %v3316_v63 = vadd.f32 %v3315_v27, %v3314_v35  ;;  %v3343_v35 = vsel %vm3183_vm0, %v2501_v17, 0.0  ;;  %v2510_v3 = vcombine.high %v2508_v5, %v2508_v5  ;;  %v3347_v57 = vsel %vm3183_vm0, %v2508_v5, 0.0 }
 0x118   :  { %v2525_v26 = vrot.slane %v2511_v11, %v3706_v15 }
 0x119   :  { %v3318_v22 = vadd.f32 %v3317_v1, %v3316_v63  ;;  %v2518_v1 = vrot.slane %v1878_v9, %v3706_v15  ;;  %v3345_v63 = vsel %vm3183_vm0, %v2509_v25, 0.0  ;;  %v3349_v28 = vsel %vm3183_vm0, %v2510_v3, 0.0  ;;  %v117_v25 = vld [vmem:[#allocation4 + $0xc8] sm:$0xff] }
 0x11a   :  { %v2527_v30 = vcombine.high %v2525_v26, %v2525_v26 }
 0x11b   :  { %v3320_v58 = vadd.f32 %v3319_v51, %v3318_v22  ;;  %v114_v51 = vld [vmem:[#allocation4 + $0xb0] sm:$0xff] }
 0x11c   :  { %v1879_v55 = vmul.f32 %v4338_v21, %v114_v51 }
 0x11d   :  { %v3322_v20 = vadd.f32 %v3321_v2, %v3320_v58  ;;  %v2526_v2 = vcombine.high %v2518_v1, %v2518_v1 }
 0x11e   :  { %v2528_v18 = vcombine.high %v1879_v55, %v1879_v55  ;;  %v2535_v10 = vrot.slane %v1879_v55, %v3706_v15 }
 0x11f   :  { %v3324_v4 = vadd.f32 %v3323_v46, %v3322_v20  ;;  %v3351_v46 = vsel %vm3183_vm0, %v2518_v1, 0.0 }
 0x120   :  { %v2542_v34 = vrot.slane %v2528_v18, %v3706_v15  ;;  %v2543_v45 = vcombine.high %v2535_v10, %v2535_v10 }
 0x121   :  { %v3326_v32 = vadd.f32 %v3325_v40, %v3324_v4  ;;  %v3353_v40 = vsel %vm3183_vm0, %v2526_v2, 0.0  ;;  %v115_v4 = vld [vmem:[#allocation4 + $0xb8] sm:$0xff] }
 0x122   :  { %v1880_v13 = vmul.f32 %v4353_v0, %v115_v4  ;;  %v3361_v54 = vsel %vm3183_vm0, %v2543_v45, 0.0 }
 0x123   :  { %v3328_v53 = vadd.f32 %v3327_v12, %v3326_v32  ;;  %v3355_v32 = vsel %vm3183_vm0, %v2525_v26, 0.0  ;;  %v118_v26 = vld [vmem:[#allocation4 + $0xd0] sm:$0xff] }
 0x124   :  { %v2545_v62 = vcombine.high %v1880_v13, %v1880_v13  ;;  %v2552_v61 = vrot.slane %v1880_v13, %v3706_v15  ;;  %v119_v13 = vld [vmem:[#allocation4 + $0xd8] sm:$0xff] }
 0x125   :  { %v3330_v19 = vadd.f32 %v3329_v42, %v3328_v53  ;;  %v3357_v42 = vsel %vm3183_vm0, %v2527_v30, 0.0  ;;  %v3359_v53 = vsel %vm3183_vm0, %v2535_v10, 0.0 }
 0x126   :  { %v2559_v6 = vrot.slane %v2545_v62, %v3706_v15  ;;  %v2560_v7 = vcombine.high %v2552_v61, %v2552_v61  ;;  %v3367_v47 = vsel %vm3183_vm0, %v2552_v61, 0.0 }
 0x127   :  { %v3332_v29 = vadd.f32 %v3331_v50, %v3330_v19  ;;  %v2544_v19 = vcombine.high %v2542_v34, %v2542_v34 }
 0x128   :  { %v3369_v5 = vsel %vm3183_vm0, %v2560_v7, 0.0 }
 0x129   :  { %v3334_v24 = vadd.f32 %v3333_v33, %v3332_v29  ;;  %v116_v33 = vld [vmem:[#allocation4 + $0xc0] sm:$0xff]  ;;  %v3365_v17 = vsel %vm3183_vm0, %v2544_v19, 0.0 }
 0x12b   :  { %v3336_v16 = vadd.f32 %v3335_v52, %v3334_v24  ;;  %v3363_v52 = vsel %vm3183_vm0, %v2542_v34, 0.0  ;;  %v1881_v24 = vmul.f32 %v4382_v23, %v116_v33 }
 0x12d   :  { %v3338_v37 = vadd.f32 %v3337_v8, %v3336_v16  ;;  %v2569_v9 = vrot.slane %v1881_v24, %v3706_v15 }
 0x12f   :  { %v3340_v27 = vadd.f32 %v3339_v60, %v3338_v37  ;;  %v2561_v60 = vcombine.high %v2559_v6, %v2559_v6  ;;  %v2562_v37 = vcombine.high %v1881_v24, %v1881_v24  ;;  %v2577_v3 = vcombine.high %v2569_v9, %v2569_v9 }
 0x131   :  { %v3342_v48 = vadd.f32 %v3341_v49, %v3340_v27  ;;  %v3371_v27 = vsel %vm3183_vm0, %v2559_v6, 0.0  ;;  %v3373_v11 = vsel %vm3183_vm0, %v2561_v60, 0.0  ;;  %v3377_v55 = vsel %vm3183_vm0, %v2577_v3, 0.0 }
 0x133   :  { %v3344_v22 = vadd.f32 %v3343_v35, %v3342_v48  ;;  %v1882_v35 = vmul.f32 %v4392_v36, %v117_v25  ;;  %v2576_v48 = vrot.slane %v2562_v37, %v3706_v15 }
 0x135   :  { %v3346_v44 = vadd.f32 %v3345_v63, %v3344_v22  ;;  %v3375_v63 = vsel %vm3183_vm0, %v2569_v9, 0.0  ;;  %v2578_v22 = vcombine.high %v2576_v48, %v2576_v48 }
 0x137   :  { %v3348_v58 = vadd.f32 %v3347_v57, %v3346_v44  ;;  %v2579_v57 = vcombine.high %v1882_v35, %v1882_v35  ;;  %v2586_v44 = vrot.slane %v1882_v35, %v3706_v15  ;;  %v3381_v30 = vsel %vm3183_vm0, %v2578_v22, 0.0 }
 0x139   :  { %v3350_v20 = vadd.f32 %v3349_v28, %v3348_v58  ;;  %v3379_v28 = vsel %vm3183_vm0, %v2576_v48, 0.0  ;;  %v1883_v58 = vmul.f32 %v4402_v39, %v118_v26  ;;  %v3383_v10 = vsel %vm3183_vm0, %v2586_v44, 0.0 }
 0x13b   :  { %v3352_v12 = vadd.f32 %v3351_v46, %v3350_v20  ;;  %v2593_v46 = vrot.slane %v2579_v57, %v3706_v15  ;;  %v2594_v20 = vcombine.high %v2586_v44, %v2586_v44 }
 0x13d   :  { %v3354_v21 = vadd.f32 %v3353_v40, %v3352_v12  ;;  %v2595_v4 = vcombine.high %v2593_v46, %v2593_v46  ;;  %v2596_v12 = vcombine.high %v1883_v58, %v1883_v58  ;;  %v3387_v45 = vsel %vm3183_vm0, %v2593_v46, 0.0 }
 0x13f   :  { %v3356_v14 = vadd.f32 %v3355_v32, %v3354_v21  ;;  %v2603_v32 = vrot.slane %v1883_v58, %v3706_v15  ;;  %v3385_v21 = vsel %vm3183_vm0, %v2594_v20, 0.0 }
 0x141   :  { %v3358_v50 = vadd.f32 %v3357_v42, %v3356_v14  ;;  %v1884_v42 = vmul.f32 %v4417_v41, %v119_v13  ;;  %v2610_v14 = vrot.slane %v2596_v12, %v3706_v15  ;;  %v3391_v62 = vsel %vm3183_vm0, %v2603_v32, 0.0  ;;  %v123_v13 = vld [vmem:[#allocation4 + $0xf8] sm:$0xff] }
 0x143   :  { %v3360_v29 = vadd.f32 %v3359_v53, %v3358_v50  ;;  %v2611_v53 = vcombine.high %v2603_v32, %v2603_v32  ;;  %v3389_v50 = vsel %vm3183_vm0, %v2595_v4, 0.0  ;;  %v2613_v33 = vcombine.high %v1884_v42, %v1884_v42 }
 0x144   :  { %v3395_v6 = vsel %vm3183_vm0, %v2610_v14, 0.0 }
 0x145   :  { %v3362_v0 = vadd.f32 %v3361_v54, %v3360_v29  ;;  %v2612_v54 = vcombine.high %v2610_v14, %v2610_v14  ;;  %v2620_v29 = vrot.slane %v1884_v42, %v3706_v15 }
 0x147   :  { %v3364_v8 = vadd.f32 %v3363_v52, %v3362_v0  ;;  %v3393_v52 = vsel %vm3183_vm0, %v2611_v53, 0.0  ;;  %v120_v0 = vld [vmem:[#allocation4 + $0xe0] sm:$0xff]  ;;  %v3399_v60 = vsel %vm3183_vm0, %v2620_v29, 0.0 }
 0x148   :  { %v1885_v7 = vmul.f32 %v4446_v43, %v120_v0 }
 0x149   :  { %v3366_v16 = vadd.f32 %v3365_v17, %v3364_v8  ;;  %v2627_v17 = vrot.slane %v2613_v33, %v3706_v15  ;;  %v2628_v8 = vcombine.high %v2620_v29, %v2620_v29 }
 0x14a   :  { %v2637_v25 = vrot.slane %v1885_v7, %v3706_v15 }
 0x14b   :  { %v3368_v49 = vadd.f32 %v3367_v47, %v3366_v16  ;;  %v3397_v47 = vsel %vm3183_vm0, %v2612_v54, 0.0  ;;  %v2629_v9 = vcombine.high %v2627_v17, %v2627_v17  ;;  %v3403_v35 = vsel %vm3183_vm0, %v2627_v17, 0.0 }
 0x14d   :  { %v3370_v23 = vadd.f32 %v3369_v5, %v3368_v49  ;;  %v2630_v5 = vcombine.high %v1885_v7, %v1885_v7  ;;  %v3401_v49 = vsel %vm3183_vm0, %v2628_v8, 0.0 }
 0x14f   :  { %v3372_v1 = vadd.f32 %v3371_v27, %v3370_v23  ;;  %v121_v27 = vld [vmem:[#allocation4 + $0xe8] sm:$0xff]  ;;  %v2644_v3 = vrot.slane %v2630_v5, %v3706_v15 }
 0x150   :  { %v1886_v48 = vmul.f32 %v4456_v56, %v121_v27 }
 0x151   :  { %v3374_v51 = vadd.f32 %v3373_v11, %v3372_v1  ;;  %v2645_v11 = vcombine.high %v2637_v25, %v2637_v25  ;;  %v3405_v1 = vsel %vm3183_vm0, %v2629_v9, 0.0  ;;  %v2646_v57 = vcombine.high %v2644_v3, %v2644_v3 }
 0x152   :  { %v2647_v44 = vcombine.high %v1886_v48, %v1886_v48 }
 0x153   :  { %v3376_v2 = vadd.f32 %v3375_v63, %v3374_v51  ;;  %v3407_v51 = vsel %vm3183_vm0, %v2637_v25, 0.0  ;;  %v3409_v26 = vsel %vm3183_vm0, %v2645_v11, 0.0  ;;  %v125_v25 = vld [vmem:[#allocation4 + $0x108] sm:$0xff] }
 0x154   :  { %v2661_v46 = vrot.slane %v2647_v44, %v3706_v15 }
 0x155   :  { %v3378_v36 = vadd.f32 %v3377_v55, %v3376_v2  ;;  %v2654_v55 = vrot.slane %v1886_v48, %v3706_v15  ;;  %v122_v2 = vld [vmem:[#allocation4 + $0xf0] sm:$0xff] }
 0x156   :  { %v1887_v58 = vmul.f32 %v4466_v31, %v122_v2  ;;  %v2663_v4 = vcombine.high %v2661_v46, %v2661_v46 }
 0x157   :  { %v3380_v18 = vadd.f32 %v3379_v28, %v3378_v36  ;;  %v3411_v36 = vsel %vm3183_vm0, %v2644_v3, 0.0  ;;  %v2662_v20 = vcombine.high %v2654_v55, %v2654_v55 }
 0x158   :  { %v2664_v12 = vcombine.high %v1887_v58, %v1887_v58  ;;  %v2671_v32 = vrot.slane %v1887_v58, %v3706_v15  ;;  %v3421_v53 = vsel %vm3183_vm0, %v2663_v4, 0.0 }
 0x159   :  { %v3382_v40 = vadd.f32 %v3381_v30, %v3380_v18  ;;  %v3413_v30 = vsel %vm3183_vm0, %v2646_v57, 0.0 }
 0x15a   :  { %v2678_v42 = vrot.slane %v2664_v12, %v3706_v15  ;;  %v2679_v14 = vcombine.high %v2671_v32, %v2671_v32 }
 0x15b   :  { %v3384_v34 = vadd.f32 %v3383_v10, %v3382_v40  ;;  %v3415_v10 = vsel %vm3183_vm0, %v2654_v55, 0.0  ;;  %v126_v55 = vld [vmem:[#allocation4 + $0x110] sm:$0xff] }
 0x15c   :  { %v3425_v29 = vsel %vm3183_vm0, %v2679_v14, 0.0 }
 0x15d   :  { %v3386_v39 = vadd.f32 %v3385_v21, %v3384_v34  ;;  %v3417_v21 = vsel %vm3183_vm0, %v2662_v20, 0.0 }
 0x15f   :  { %v3388_v19 = vadd.f32 %v3387_v45, %v3386_v39  ;;  %v3419_v45 = vsel %vm3183_vm0, %v2661_v46, 0.0  ;;  %v1888_v39 = vmul.f32 %v4481_v59, %v123_v13 }
 0x161   :  { %v3390_v61 = vadd.f32 %v3389_v50, %v3388_v19  ;;  %v3423_v19 = vsel %vm3183_vm0, %v2671_v32, 0.0  ;;  %v2681_v54 = vcombine.high %v1888_v39, %v1888_v39  ;;  %v2688_v33 = vrot.slane %v1888_v39, %v3706_v15 }
 0x163   :  { %v3392_v24 = vadd.f32 %v3391_v62, %v3390_v61  ;;  %v2680_v61 = vcombine.high %v2678_v42, %v2678_v42  ;;  %v2696_v7 = vcombine.high %v2688_v33, %v2688_v33 }
 0x165   :  { %v3394_v41 = vadd.f32 %v3393_v52, %v3392_v24  ;;  %v124_v52 = vld [vmem:[#allocation4 + $0x100] sm:$0xff]  ;;  %v3427_v24 = vsel %vm3183_vm0, %v2678_v42, 0.0  ;;  %v3429_v17 = vsel %vm3183_vm0, %v2680_v61, 0.0  ;;  %v3433_v5 = vsel %vm3183_vm0, %v2696_v7, 0.0 }
 0x167   :  { %v3396_v16 = vadd.f32 %v3395_v6, %v3394_v41  ;;  %v1889_v6 = vmul.f32 %v4510_v38, %v124_v52  ;;  %v2695_v41 = vrot.slane %v2681_v54, %v3706_v15  ;;  %v128_v52 = vld [vmem:[#allocation4 + $0x120] sm:$0xff] }
 0x169   :  { %v3398_v37 = vadd.f32 %v3397_v47, %v3396_v16  ;;  %v3431_v47 = vsel %vm3183_vm0, %v2688_v33, 0.0  ;;  %v2705_v9 = vrot.slane %v1889_v6, %v3706_v15  ;;  %v3435_v27 = vsel %vm3183_vm0, %v2695_v41, 0.0 }
 0x16b   :  { %v3400_v23 = vadd.f32 %v3399_v60, %v3398_v37  ;;  %v2697_v60 = vcombine.high %v2695_v41, %v2695_v41  ;;  %v2698_v37 = vcombine.high %v1889_v6, %v1889_v6  ;;  %v2713_v48 = vcombine.high %v2705_v9, %v2705_v9  ;;  %v5278_v6 = vld [vmem:[#allocation13_spill] sm:$0xff] }
 0x16c   :  { %v1893_v41 = vmul.f32 %v5278_v6, %v128_v52 }
 0x16d   :  { %v3402_v43 = vadd.f32 %v3401_v49, %v3400_v23  ;;  %v5275_v23 = vld [vmem:[#allocation10_spill] sm:$0xff]  ;;  %v3437_v3 = vsel %vm3183_vm0, %v2697_v60, 0.0  ;;  %v3441_v44 = vsel %vm3183_vm0, %v2713_v48, 0.0 }
 0x16f   :  { %v3404_v63 = vadd.f32 %v3403_v35, %v3402_v43  ;;  %v1890_v35 = vmul.f32 %v5275_v23, %v125_v25  ;;  %v2712_v43 = vrot.slane %v2698_v37, %v3706_v15 }
 0x171   :  { %v3406_v22 = vadd.f32 %v3405_v1, %v3404_v63  ;;  %v3439_v1 = vsel %vm3183_vm0, %v2705_v9, 0.0  ;;  %v2722_v57 = vrot.slane %v1890_v35, %v3706_v15  ;;  %v3443_v2 = vsel %vm3183_vm0, %v2712_v43, 0.0 }
 0x172   :  { %v2766_v9 = vcombine.high %v1893_v41, %v1893_v41 }
 0x173   :  { %v3408_v28 = vadd.f32 %v3407_v51, %v3406_v22  ;;  %v2714_v51 = vcombine.high %v2712_v43, %v2712_v43  ;;  %v2715_v22 = vcombine.high %v1890_v35, %v1890_v35  ;;  %v2730_v46 = vcombine.high %v2722_v57, %v2722_v57  ;;  %v5279_v35 = vld [vmem:[#allocation14_spill] sm:$0xff] }
 0x174   :  { %v2780_v48 = vrot.slane %v2766_v9, %v3706_v15 }
 0x175   :  { %v3410_v56 = vadd.f32 %v3409_v26, %v3408_v28  ;;  %v2729_v58 = vrot.slane %v2715_v22, %v3706_v15  ;;  %v3445_v20 = vsel %vm3183_vm0, %v2714_v51, 0.0  ;;  %v3449_v32 = vsel %vm3183_vm0, %v2730_v46, 0.0 }
 0x176   :  { %v2782_v22 = vcombine.high %v2780_v48, %v2780_v48 }
 0x177   :  { %v3412_v18 = vadd.f32 %v3411_v36, %v3410_v56  ;;  %v5276_v36 = vld [vmem:[#allocation11_spill] sm:$0xff] }
 0x178   :  { %v1891_v56 = vmul.f32 %v5276_v36, %v126_v55 }
 0x179   :  { %v3414_v40 = vadd.f32 %v3413_v30, %v3412_v18  ;;  %v3447_v18 = vsel %vm3183_vm0, %v2722_v57, 0.0 }
 0x17a   :  { %v2732_v4 = vcombine.high %v1891_v56, %v1891_v56  ;;  %v2739_v12 = vrot.slane %v1891_v56, %v3706_v15  ;;  %v5280_v56 = vld [vmem:[#allocation15_spill] sm:$0xff] }
 0x17b   :  { %v3416_v34 = vadd.f32 %v3415_v10, %v3414_v40  ;;  %v2731_v40 = vcombine.high %v2729_v58, %v2729_v58 }
 0x17c   :  { %v2746_v42 = vrot.slane %v2732_v4, %v3706_v15  ;;  %v2747_v14 = vcombine.high %v2739_v12, %v2739_v12 }
 0x17d   :  { %v3418_v31 = vadd.f32 %v3417_v21, %v3416_v34  ;;  %v127_v21 = vld [vmem:[#allocation4 + $0x118] sm:$0xff]  ;;  %v3451_v34 = vsel %vm3183_vm0, %v2729_v58, 0.0 }
 0x17e   :  { %v2748_v61 = vcombine.high %v2746_v42, %v2746_v42 }
 0x17f   :  { %v3420_v50 = vadd.f32 %v3419_v45, %v3418_v31  ;;  %v5277_v31 = vld [vmem:[#allocation12_spill] sm:$0xff] }
 0x180   :  { %v1892_v39 = vmul.f32 %v5277_v31, %v127_v21 }
 0x181   :  { %v3422_v62 = vadd.f32 %v3421_v53, %v3420_v50  ;;  %v3453_v53 = vsel %vm3183_vm0, %v2731_v40, 0.0 }
 0x182   :  { %v2749_v54 = vcombine.high %v1892_v39, %v1892_v39  ;;  %v2756_v33 = vrot.slane %v1892_v39, %v3706_v15  ;;  %v5281_v39 = vld [vmem:[#allocation16_spill] sm:$0xff] }
 0x183   :  { %v3424_v0 = vadd.f32 %v3423_v19, %v3422_v62  ;;  %v3455_v19 = vsel %vm3183_vm0, %v2739_v12, 0.0 }
 0x184   :  { %v2763_v7 = vrot.slane %v2749_v54, %v3706_v15 }
 0x185   :  { %v3426_v59 = vadd.f32 %v3425_v29, %v3424_v0  ;;  %v3457_v29 = vsel %vm3183_vm0, %v2747_v14, 0.0 }
 0x186   :  { %v2765_v37 = vcombine.high %v2763_v7, %v2763_v7 }
 0x187   :  { %v3428_v8 = vadd.f32 %v3427_v24, %v3426_v59  ;;  %v3459_v24 = vsel %vm3183_vm0, %v2746_v42, 0.0 }
 0x189   :  { %v3430_v16 = vadd.f32 %v3429_v17, %v3428_v8  ;;  %v2764_v17 = vcombine.high %v2756_v33, %v2756_v33  ;;  %v3461_v8 = vsel %vm3183_vm0, %v2748_v61, 0.0 }
 0x18b   :  { %v3432_v49 = vadd.f32 %v3431_v47, %v3430_v16  ;;  %v3463_v16 = vsel %vm3183_vm0, %v2756_v33, 0.0  ;;  %v3465_v25 = vsel %vm3183_vm0, %v2764_v17, 0.0 }
 0x18d   :  { %v3434_v38 = vadd.f32 %v3433_v5, %v3432_v49  ;;  %v2773_v5 = vrot.slane %v1893_v41, %v3706_v15  ;;  %v129_v49 = vld [vmem:[#allocation4 + $0x128] sm:$0xff] }
 0x18e   :  { %v1894_v43 = vmul.f32 %v5279_v35, %v129_v49  ;;  %v5282_v41 = vld [vmem:[#allocation17_spill] sm:$0xff] }
 0x18f   :  { %v3436_v11 = vadd.f32 %v3435_v27, %v3434_v38  ;;  %v3467_v38 = vsel %vm3183_vm0, %v2763_v7, 0.0 }
 0x190   :  { %v2783_v57 = vcombine.high %v1894_v43, %v1894_v43 }
 0x191   :  { %v3438_v63 = vadd.f32 %v3437_v3, %v3436_v11  ;;  %v2781_v3 = vcombine.high %v2773_v5, %v2773_v5  ;;  %v3469_v11 = vsel %vm3183_vm0, %v2765_v37, 0.0 }
 0x192   :  { %v2797_v46 = vrot.slane %v2783_v57, %v3706_v15 }
 0x193   :  { %v3440_v26 = vadd.f32 %v3439_v1, %v3438_v63  ;;  %v3471_v63 = vsel %vm3183_vm0, %v2773_v5, 0.0  ;;  %v3473_v55 = vsel %vm3183_vm0, %v2781_v3, 0.0 }
 0x194   :  { %v2799_v4 = vcombine.high %v2797_v46, %v2797_v46 }
 0x195   :  { %v3442_v28 = vadd.f32 %v3441_v44, %v3440_v26  ;;  %v2790_v44 = vrot.slane %v1894_v43, %v3706_v15  ;;  %v130_v26 = vld [vmem:[#allocation4 + $0x130] sm:$0xff] }
 0x196   :  { %v1895_v58 = vmul.f32 %v5280_v56, %v130_v26  ;;  %v5283_v43 = vld [vmem:[#allocation18_spill] sm:$0xff] }
 0x197   :  { %v3444_v30 = vadd.f32 %v3443_v2, %v3442_v28  ;;  %v3475_v28 = vsel %vm3183_vm0, %v2780_v48, 0.0 }
 0x198   :  { %v2800_v12 = vcombine.high %v1895_v58, %v1895_v58 }
 0x199   :  { %v3446_v10 = vadd.f32 %v3445_v20, %v3444_v30  ;;  %v2798_v20 = vcombine.high %v2790_v44, %v2790_v44  ;;  %v3477_v30 = vsel %vm3183_vm0, %v2782_v22, 0.0 }
 0x19a   :  { %v2814_v14 = vrot.slane %v2800_v12, %v3706_v15 }
 0x19b   :  { %v3448_v13 = vadd.f32 %v3447_v18, %v3446_v10  ;;  %v3479_v10 = vsel %vm3183_vm0, %v2790_v44, 0.0  ;;  %v3481_v21 = vsel %vm3183_vm0, %v2798_v20, 0.0 }
 0x19c   :  { %v2816_v54 = vcombine.high %v2814_v14, %v2814_v14 }
 0x19d   :  { %v3450_v45 = vadd.f32 %v3449_v32, %v3448_v13  ;;  %v2807_v32 = vrot.slane %v1895_v58, %v3706_v15  ;;  %v131_v13 = vld [vmem:[#allocation4 + $0x138] sm:$0xff] }
 0x19e   :  { %v1896_v42 = vmul.f32 %v5281_v39, %v131_v13  ;;  %v5284_v58 = vld [vmem:[#allocation19_spill] sm:$0xff] }
 0x19f   :  { %v3452_v50 = vadd.f32 %v3451_v34, %v3450_v45  ;;  %v3483_v45 = vsel %vm3183_vm0, %v2797_v46, 0.0 }
 0x1a0   :  { %v2817_v33 = vcombine.high %v1896_v42, %v1896_v42 }
 0x1a1   :  { %v3454_v62 = vadd.f32 %v3453_v53, %v3452_v50  ;;  %v2815_v53 = vcombine.high %v2807_v32, %v2807_v32  ;;  %v3485_v50 = vsel %vm3183_vm0, %v2799_v4, 0.0 }
 0x1a2   :  { %v2831_v17 = vrot.slane %v2817_v33, %v3706_v15 }
 0x1a3   :  { %v3456_v0 = vadd.f32 %v3455_v19, %v3454_v62  ;;  %v3487_v62 = vsel %vm3183_vm0, %v2807_v32, 0.0  ;;  %v3489_v52 = vsel %vm3183_vm0, %v2815_v53, 0.0 }
 0x1a4   :  { %v2833_v9 = vcombine.high %v2831_v17, %v2831_v17 }
 0x1a5   :  { %v3458_v59 = vadd.f32 %v3457_v29, %v3456_v0  ;;  %v2824_v29 = vrot.slane %v1896_v42, %v3706_v15  ;;  %v132_v0 = vld [vmem:[#allocation4 + $0x140] sm:$0xff] }
 0x1a6   :  { %v1897_v7 = vmul.f32 %v5282_v41, %v132_v0  ;;  %v5285_v42 = vld [vmem:[#allocation20_spill] sm:$0xff] }
 0x1a7   :  { %v3460_v47 = vadd.f32 %v3459_v24, %v3458_v59  ;;  %v3491_v59 = vsel %vm3183_vm0, %v2814_v14, 0.0 }
 0x1a8   :  { %v2834_v5 = vcombine.high %v1897_v7, %v1897_v7 }
 0x1a9   :  { %v3462_v60 = vadd.f32 %v3461_v8, %v3460_v47  ;;  %v2832_v8 = vcombine.high %v2824_v29, %v2824_v29  ;;  %v3493_v47 = vsel %vm3183_vm0, %v2816_v54, 0.0 }
 0x1aa   :  { %v2848_v3 = vrot.slane %v2834_v5, %v3706_v15 }
 0x1ab   :  { %v3464_v27 = vadd.f32 %v3463_v16, %v3462_v60  ;;  %v3495_v60 = vsel %vm3183_vm0, %v2824_v29, 0.0  ;;  %v3497_v49 = vsel %vm3183_vm0, %v2832_v8, 0.0 }
 0x1ac   :  { %v2850_v57 = vcombine.high %v2848_v3, %v2848_v3 }
 0x1ad   :  { %v3466_v23 = vadd.f32 %v3465_v25, %v3464_v27  ;;  %v2841_v25 = vrot.slane %v1897_v7, %v3706_v15  ;;  %v133_v27 = vld [vmem:[#allocation4 + $0x148] sm:$0xff] }
 0x1ae   :  { %v1898_v48 = vmul.f32 %v5283_v43, %v133_v27  ;;  %v5286_v7 = vld [vmem:[#allocation21_spill] sm:$0xff] }
 0x1af   :  { %v3468_v1 = vadd.f32 %v3467_v38, %v3466_v23  ;;  %v3499_v23 = vsel %vm3183_vm0, %v2831_v17, 0.0 }
 0x1b0   :  { %v2851_v44 = vcombine.high %v1898_v48, %v1898_v48 }
 0x1b1   :  { %v3470_v51 = vadd.f32 %v3469_v11, %v3468_v1  ;;  %v2849_v11 = vcombine.high %v2841_v25, %v2841_v25  ;;  %v3501_v1 = vsel %vm3183_vm0, %v2833_v9, 0.0 }
 0x1b2   :  { %v2865_v20 = vrot.slane %v2851_v44, %v3706_v15 }
 0x1b3   :  { %v3472_v2 = vadd.f32 %v3471_v63, %v3470_v51  ;;  %v3503_v51 = vsel %vm3183_vm0, %v2841_v25, 0.0  ;;  %v3505_v26 = vsel %vm3183_vm0, %v2849_v11, 0.0 }
 0x1b4   :  { %v2867_v12 = vcombine.high %v2865_v20, %v2865_v20 }
 0x1b5   :  { %v3474_v36 = vadd.f32 %v3473_v55, %v3472_v2  ;;  %v2858_v55 = vrot.slane %v1898_v48, %v3706_v15  ;;  %v134_v2 = vld [vmem:[#allocation4 + $0x150] sm:$0xff] }
 0x1b6   :  { %v1899_v46 = vmul.f32 %v5284_v58, %v134_v2  ;;  %v5287_v48 = vld [vmem:[#allocation22_spill] sm:$0xff] }
 0x1b7   :  { %v3476_v18 = vadd.f32 %v3475_v28, %v3474_v36  ;;  %v3507_v36 = vsel %vm3183_vm0, %v2848_v3, 0.0 }
 0x1b8   :  { %v2868_v32 = vcombine.high %v1899_v46, %v1899_v46 }
 0x1b9   :  { %v3478_v40 = vadd.f32 %v3477_v30, %v3476_v18  ;;  %v2866_v30 = vcombine.high %v2858_v55, %v2858_v55  ;;  %v3509_v18 = vsel %vm3183_vm0, %v2850_v57, 0.0 }
 0x1ba   :  { %v2882_v53 = vrot.slane %v2868_v32, %v3706_v15 }
 0x1bb   :  { %v3480_v34 = vadd.f32 %v3479_v10, %v3478_v40  ;;  %v3511_v40 = vsel %vm3183_vm0, %v2858_v55, 0.0  ;;  %v3513_v13 = vsel %vm3183_vm0, %v2866_v30, 0.0 }
 0x1bc   :  { %v2884_v33 = vcombine.high %v2882_v53, %v2882_v53 }
 0x1bd   :  { %v3482_v31 = vadd.f32 %v3481_v21, %v3480_v34  ;;  %v2875_v21 = vrot.slane %v1899_v46, %v3706_v15  ;;  %v135_v34 = vld [vmem:[#allocation4 + $0x158] sm:$0xff] }
 0x1be   :  { %v1900_v14 = vmul.f32 %v5285_v42, %v135_v34  ;;  %v5288_v46 = vld [vmem:[#allocation23_spill] sm:$0xff] }
 0x1bf   :  { %v3484_v19 = vadd.f32 %v3483_v45, %v3482_v31  ;;  %v3515_v31 = vsel %vm3183_vm0, %v2865_v20, 0.0 }
 0x1c0   :  { %v2885_v29 = vcombine.high %v1900_v14, %v1900_v14 }
 0x1c1   :  { %v3486_v61 = vadd.f32 %v3485_v50, %v3484_v19  ;;  %v2883_v50 = vcombine.high %v2875_v21, %v2875_v21  ;;  %v3517_v19 = vsel %vm3183_vm0, %v2867_v12, 0.0 }
 0x1c2   :  { %v2899_v8 = vrot.slane %v2885_v29, %v3706_v15 }
 0x1c3   :  { %v3488_v24 = vadd.f32 %v3487_v62, %v3486_v61  ;;  %v3519_v61 = vsel %vm3183_vm0, %v2875_v21, 0.0  ;;  %v3521_v0 = vsel %vm3183_vm0, %v2883_v50, 0.0 }
 0x1c4   :  { %v2901_v5 = vcombine.high %v2899_v8, %v2899_v8 }
 0x1c5   :  { %v3490_v6 = vadd.f32 %v3489_v52, %v3488_v24  ;;  %v2892_v52 = vrot.slane %v1900_v14, %v3706_v15  ;;  %v136_v24 = vld [vmem:[#allocation4 + $0x160] sm:$0xff] }
 0x1c6   :  { %v1901_v17 = vmul.f32 %v5286_v7, %v136_v24  ;;  %v5289_v14 = vld [vmem:[#allocation24_spill] sm:$0xff] }
 0x1c7   :  { %v3492_v16 = vadd.f32 %v3491_v59, %v3490_v6  ;;  %v3523_v6 = vsel %vm3183_vm0, %v2882_v53, 0.0 }
 0x1c8   :  { %v2902_v25 = vcombine.high %v1901_v17, %v1901_v17 }
 0x1c9   :  { %v3494_v37 = vadd.f32 %v3493_v47, %v3492_v16  ;;  %v2900_v47 = vcombine.high %v2892_v52, %v2892_v52  ;;  %v3525_v16 = vsel %vm3183_vm0, %v2884_v33, 0.0 }
 0x1ca   :  { %v2916_v11 = vrot.slane %v2902_v25, %v3706_v15 }
 0x1cb   :  { %v3496_v38 = vadd.f32 %v3495_v60, %v3494_v37  ;;  %v3527_v37 = vsel %vm3183_vm0, %v2892_v52, 0.0  ;;  %v3529_v27 = vsel %vm3183_vm0, %v2900_v47, 0.0 }
 0x1cc   :  { %v2918_v44 = vcombine.high %v2916_v11, %v2916_v11 }
 0x1cd   :  { %v3498_v35 = vadd.f32 %v3497_v49, %v3496_v38  ;;  %v2909_v49 = vrot.slane %v1901_v17, %v3706_v15  ;;  %v137_v38 = vld [vmem:[#allocation4 + $0x168] sm:$0xff] }
 0x1ce   :  { %v1902_v3 = vmul.f32 %v5287_v48, %v137_v38  ;;  %v5290_v17 = vld [vmem:[#allocation25_spill] sm:$0xff] }
 0x1cf   :  { %v3500_v63 = vadd.f32 %v3499_v23, %v3498_v35  ;;  %v3531_v35 = vsel %vm3183_vm0, %v2899_v8, 0.0 }
 0x1d0   :  { %v2919_v55 = vcombine.high %v1902_v3, %v1902_v3 }
 0x1d1   :  { %v3502_v22 = vadd.f32 %v3501_v1, %v3500_v63  ;;  %v2917_v1 = vcombine.high %v2909_v49, %v2909_v49  ;;  %v3533_v63 = vsel %vm3183_vm0, %v2901_v5, 0.0 }
 0x1d2   :  { %v2933_v30 = vrot.slane %v2919_v55, %v3706_v15 }
 0x1d3   :  { %v3504_v28 = vadd.f32 %v3503_v51, %v3502_v22  ;;  %v3535_v22 = vsel %vm3183_vm0, %v2909_v49, 0.0  ;;  %v3537_v2 = vsel %vm3183_vm0, %v2917_v1, 0.0 }
 0x1d4   :  { %v2935_v32 = vcombine.high %v2933_v30, %v2933_v30 }
 0x1d5   :  { %v3506_v56 = vadd.f32 %v3505_v26, %v3504_v28  ;;  %v2926_v26 = vrot.slane %v1902_v3, %v3706_v15  ;;  %v138_v28 = vld [vmem:[#allocation4 + $0x170] sm:$0xff] }
 0x1d6   :  { %v1903_v20 = vmul.f32 %v5288_v46, %v138_v28 }
 0x1d7   :  { %v3508_v10 = vadd.f32 %v3507_v36, %v3506_v56  ;;  %v3539_v56 = vsel %vm3183_vm0, %v2916_v11, 0.0 }
 0x1d8   :  { %v2936_v21 = vcombine.high %v1903_v20, %v1903_v20 }
 0x1d9   :  { %v3510_v4 = vadd.f32 %v3509_v18, %v3508_v10  ;;  %v2934_v18 = vcombine.high %v2926_v26, %v2926_v26  ;;  %v3541_v10 = vsel %vm3183_vm0, %v2918_v44, 0.0 }
 0x1da   :  { %v2950_v50 = vrot.slane %v2936_v21, %v3706_v15 }
 0x1db   :  { %v3512_v45 = vadd.f32 %v3511_v40, %v3510_v4  ;;  %v3543_v4 = vsel %vm3183_vm0, %v2926_v26, 0.0  ;;  %v3545_v34 = vsel %vm3183_vm0, %v2934_v18, 0.0 }
 0x1dc   :  { %v2952_v29 = vcombine.high %v2950_v50, %v2950_v50 }
 0x1dd   :  { %v3514_v39 = vadd.f32 %v3513_v13, %v3512_v45  ;;  %v2943_v13 = vrot.slane %v1903_v20, %v3706_v15  ;;  %v139_v45 = vld [vmem:[#allocation4 + $0x178] sm:$0xff] }
 0x1de   :  { %v1904_v53 = vmul.f32 %v5289_v14, %v139_v45 }
 0x1df   :  { %v3516_v62 = vadd.f32 %v3515_v31, %v3514_v39  ;;  %v3547_v39 = vsel %vm3183_vm0, %v2933_v30, 0.0 }
 0x1e0   :  { %v2953_v52 = vcombine.high %v1904_v53, %v1904_v53 }
 0x1e1   :  { %v3518_v54 = vadd.f32 %v3517_v19, %v3516_v62  ;;  %v2951_v19 = vcombine.high %v2943_v13, %v2943_v13  ;;  %v3549_v62 = vsel %vm3183_vm0, %v2935_v32, 0.0 }
 0x1e2   :  { %v2967_v47 = vrot.slane %v2953_v52, %v3706_v15 }
 0x1e3   :  { %v3520_v59 = vadd.f32 %v3519_v61, %v3518_v54  ;;  %v3551_v54 = vsel %vm3183_vm0, %v2943_v13, 0.0  ;;  %v3553_v24 = vsel %vm3183_vm0, %v2951_v19, 0.0 }
 0x1e4   :  { %v2969_v25 = vcombine.high %v2967_v47, %v2967_v47 }
 0x1e5   :  { %v3522_v41 = vadd.f32 %v3521_v0, %v3520_v59  ;;  %v2960_v0 = vrot.slane %v1904_v53, %v3706_v15  ;;  %v140_v59 = vld [vmem:[#allocation4 + $0x180] sm:$0xff] }
 0x1e6   :  { %v1905_v8 = vmul.f32 %v5290_v17, %v140_v59  ;;  %v3565_v11 = vsel %vm3183_vm0, %v2969_v25, 0.0 }
 0x1e7   :  { %v3524_v60 = vadd.f32 %v3523_v6, %v3522_v41  ;;  %v3555_v41 = vsel %vm3183_vm0, %v2950_v50, 0.0 }
 0x1e8   :  { %v2970_v49 = vcombine.high %v1905_v8, %v1905_v8 }
 0x1e9   :  { %v3526_v9 = vadd.f32 %v3525_v16, %v3524_v60  ;;  %v2968_v16 = vcombine.high %v2960_v0, %v2960_v0  ;;  %v3557_v60 = vsel %vm3183_vm0, %v2952_v29, 0.0 }
 0x1ea   :  { %v2984_v48 = vrot.slane %v2970_v49, %v3706_v15 }
 0x1eb   :  { %v3528_v23 = vadd.f32 %v3527_v37, %v3526_v9  ;;  %v3559_v9 = vsel %vm3183_vm0, %v2960_v0, 0.0  ;;  %v3561_v38 = vsel %vm3183_vm0, %v2968_v16, 0.0 }
 0x1ec   :  { %v3571_v55 = vsel %vm3183_vm0, %v2984_v48, 0.0 }
 0x1ed   :  { %v3530_v43 = vadd.f32 %v3529_v27, %v3528_v23  ;;  %v2977_v27 = vrot.slane %v1905_v8, %v3706_v15  ;;  %v3578_v15 = vstv %s5121_s2 }
 0x1ef   :  { %v3532_v51 = vadd.f32 %v3531_v35, %v3530_v43  ;;  %v3563_v35 = vsel %vm3183_vm0, %v2967_v47, 0.0  ;;  %v2985_v3 = vcombine.high %v2977_v27, %v2977_v27 }
 0x1f1   :  { %v3534_v57 = vadd.f32 %v3533_v63, %v3532_v51  ;;  %v3567_v63 = vsel %vm3183_vm0, %v2977_v27, 0.0 }
 0x1f3   :  { %v3536_v36 = vadd.f32 %v3535_v22, %v3534_v57  ;;  %v2986_v22 = vcombine.high %v2984_v48, %v2984_v48  ;;  %v3569_v57 = vsel %vm3183_vm0, %v2985_v3, 0.0 }
 0x1f5   :  { %v3538_v58 = vadd.f32 %v3537_v2, %v3536_v36  ;;  %v3573_v2 = vsel %vm3183_vm0, %v2986_v22, 0.0 }
 0x1f7   :  { %v3540_v40 = vadd.f32 %v3539_v56, %v3538_v58 }
 0x1f9   :  { %v3542_v12 = vadd.f32 %v3541_v10, %v3540_v40 }
 0x1fb   :  { %v3544_v31 = vadd.f32 %v3543_v4, %v3542_v12 }
 0x1fd   :  { %v3546_v42 = vadd.f32 %v3545_v34, %v3544_v31 }
 0x1ff   :  { %v3548_v61 = vadd.f32 %v3547_v39, %v3546_v42 }
 0x201   :  { %v3550_v33 = vadd.f32 %v3549_v62, %v3548_v61 }
 0x203   :  { %v3552_v6 = vadd.f32 %v3551_v54, %v3550_v33 }
 0x205   :  { %v3554_v7 = vadd.f32 %v3553_v24, %v3552_v6 }
 0x207   :  { %v3556_v37 = vadd.f32 %v3555_v41, %v3554_v7 }
 0x209   :  { %v3558_v5 = vadd.f32 %v3557_v60, %v3556_v37 }
 0x20b   :  { %v3560_v23 = vadd.f32 %v3559_v9, %v3558_v5 }
 0x20d   :  { %v3562_v43 = vadd.f32 %v3561_v38, %v3560_v23 }
 0x20f   :  { %v3564_v1 = vadd.f32 %v3563_v35, %v3562_v43 }
 0x211   :  { %v3566_v51 = vadd.f32 %v3565_v11, %v3564_v1 }
 0x213   :  { %v3568_v44 = vadd.f32 %v3567_v63, %v3566_v51 }
 0x215   :  { %v3570_v26 = vadd.f32 %v3569_v57, %v3568_v44 }
 0x217   :  { %v3572_v28 = vadd.f32 %v3571_v55, %v3570_v26 }
 0x219   :  { %v3574_v36 = vadd.f32 %v3573_v2, %v3572_v28 }
 0x21b   :  { %3575 = vadd.xlane.f32.xlu0 %v3574_v36 }
 0x2a8   :  { %v3576_v56 = vpop.xlane.xlu0 %3575 }
 0x2a9   :  { %v3579_v58 = vadd.f32 %v3578_v15, %v3576_v56 }
 0x2ab   :  { %3581 = vst.msk [vmem:[%s5122_s3] sm:$0x3] %vm3580_vm1, %v3579_v58 }
 0x2ac   :  { %3586 = vsyncpa [#allocation5], 1 }
 0x2ad   :  { %3587 = vsyncpa [#allocation7], 1 }

</bundles_post_ra>
